<compile_context>
chip_gen: v6e
topology: v6e:2x2x1
jax: 0.10.0
libtpu: 0.0.40
codegen_flags: <defaults>
</compile_context>

<pallas_src>
import functools
import math

import jax
import jax.numpy as jnp
import numpy as np
from jax.experimental import pallas as pl
from jax.experimental.pallas import tpu as pltpu

_HIGHEST = jax.lax.Precision.HIGHEST
_LN_EPS = 1e-5  # torch.nn.LayerNorm default


def _layer_norm(x, gamma, beta):
    # x: (L, H); gamma/beta: (1, H)
    mu = jnp.mean(x, axis=-1, keepdims=True)
    xc = x - mu
    var = jnp.mean(xc * xc, axis=-1, keepdims=True)
    inv = jax.lax.rsqrt(var + _LN_EPS)
    return xc * inv * gamma + beta


def _uqe_kernel(x_ref, mask_ref,
                wp_ref, posb_ref, g1_ref, be1_ref,
                wqkv_ref, bqkv_ref,
                wo_ref, bo_ref, g2_ref, be2_ref,
                out_ref,
                ctx_scr,
                *, num_heads, head_dim, hidden):
    # ---- latent projection (single MXU matmul over the concatenated sequence) ----
    h = jnp.dot(x_ref[0].astype(jnp.float32), wp_ref[...], precision=_HIGHEST)

    # ---- trainable positional encoding: + (proj bias + pos emb), LayerNorm ----
    y = _layer_norm(h + posb_ref[...], g1_ref[...], be1_ref[...])        # (L, H)

    # ---- BertSelfAttention: fused QKV projection, per-head softmax attention ----
    qkv = jnp.dot(y, wqkv_ref[...], precision=_HIGHEST) + bqkv_ref[...]  # (L, 3H)
    q = qkv[:, :hidden]
    k = qkv[:, hidden:2 * hidden]
    v = qkv[:, 2 * hidden:]

    bias = (1.0 - mask_ref[0]) * (-10000.0)                              # (1, L) additive mask
    scale = 1.0 / math.sqrt(head_dim)
    for hh in range(num_heads):
        lo = hh * head_dim
        qh = q[:, lo:lo + head_dim]                                      # (L, dh)
        kh = k[:, lo:lo + head_dim]
        vh = v[:, lo:lo + head_dim]
        # q @ k^T without materializing the transpose
        s = jax.lax.dot_general(qh, kh, (((1,), (1,)), ((), ())),
                                precision=_HIGHEST) * scale + bias       # (L, L)
        s = s - jnp.max(s, axis=-1, keepdims=True)
        p = jnp.exp(s)
        p = p / jnp.sum(p, axis=-1, keepdims=True)
        ctx_scr[:, lo:lo + head_dim] = jnp.dot(p, vh, precision=_HIGHEST)

    # ---- BertSelfOutput: dense + residual + LayerNorm ----
    o = jnp.dot(ctx_scr[...], wo_ref[...], precision=_HIGHEST) + bo_ref[...]
    out = _layer_norm(o + y, g2_ref[...], be2_ref[...])
    out_ref[0] = out.astype(out_ref.dtype)


def unified_query_encoder(desc_query, desc_query_mask, image_query, image_query_mask,
                          params, *, num_heads):
    """Mirrors UnifiedQueryEncoder.forward (SEPARATE=False, eval mode).

    Returns (mutimodal_query (N, Li+Lq, H), mutimodal_query_mask (N, Li+Lq) of ones).
    """
    n, lq, din = desc_query.shape
    _, li, _ = image_query.shape
    L = li + lq
    H = params["w_proj"].shape[1]
    assert H % num_heads == 0
    head_dim = H // num_heads

    # Wrapper-side layout plumbing (cheap, outside the fused kernel):
    x = jnp.concatenate([image_query, desc_query], axis=1)               # torch.cat order
    mask = jnp.concatenate([image_query_mask, desc_query_mask], axis=1)
    mask = mask.astype(jnp.float32).reshape(n, 1, L)
    pos_plus_bias = params["pos_emb"][:L] + params["b_proj"]             # (L, H)
    wqkv = jnp.concatenate([params["wq"], params["wk"], params["wv"]], axis=1)   # (H, 3H)
    bqkv = jnp.concatenate([params["bq"], params["bk"], params["bv"]], axis=1)   # (1, 3H)

    def resident(shape):
        return pl.BlockSpec(shape, lambda b, _n=len(shape): (0,) * _n)

    kernel = functools.partial(_uqe_kernel, num_heads=num_heads,
                               head_dim=head_dim, hidden=H)

    out = pl.pallas_call(
        kernel,
        out_shape=jax.ShapeDtypeStruct((n, L, H), jnp.float32),
        grid_spec=pltpu.PrefetchScalarGridSpec(
            num_scalar_prefetch=0,
            grid=(n,),
            in_specs=[
                pl.BlockSpec((1, L, din), lambda b: (b, 0, 0)),   # concat(image, desc)
                pl.BlockSpec((1, 1, L), lambda b: (b, 0, 0)),     # attention mask
                resident((din, H)),                               # w_proj
                resident((L, H)),                                 # pos emb + proj bias
                resident((1, H)), resident((1, H)),               # LN1 gamma/beta
                resident((H, 3 * H)), resident((1, 3 * H)),       # fused Wqkv, bqkv
                resident((H, H)), resident((1, H)),               # Wo, bo
                resident((1, H)), resident((1, H)),               # LN2 gamma/beta
            ],
            out_specs=pl.BlockSpec((1, L, H), lambda b: (b, 0, 0)),
            scratch_shapes=[pltpu.VMEM((L, H), jnp.float32)],     # attention context
        ),
        compiler_params=pltpu.CompilerParams(
            dimension_semantics=("parallel",),                    # batch is independent
        ),
    )(x, mask,
      params["w_proj"], pos_plus_bias,
      params["ln1_g"], params["ln1_b"],
      wqkv, bqkv,
      params["wo"], params["bo"],
      params["ln2_g"], params["ln2_b"])

    out_mask = jnp.ones((n, L), dtype=desc_query_mask.dtype)
    return out, out_mask


def _reference(desc_query, desc_query_mask, image_query, image_query_mask, params, *, num_heads):
    """Pure-JAX reference mirroring the PyTorch module (eval mode)."""
    x = jnp.concatenate([image_query, desc_query], axis=1)
    mask = jnp.concatenate([image_query_mask, desc_query_mask], axis=1).astype(jnp.float32)
    n, L, _ = x.shape
    H = params["w_proj"].shape[1]
    dh = H // num_heads

    def ln(z, g, b):
        mu = jnp.mean(z, -1, keepdims=True)
        var = jnp.mean((z - mu) ** 2, -1, keepdims=True)
        return (z - mu) / jnp.sqrt(var + _LN_EPS) * g + b

    h = jnp.einsum("nld,dh->nlh", x, params["w_proj"], precision=_HIGHEST) + params["b_proj"]
    h = h + params["pos_emb"][:L][None]
    y = ln(h, params["ln1_g"], params["ln1_b"])

    def proj(z, w, b):
        return (jnp.einsum("nlh,hk->nlk", z, w, precision=_HIGHEST) + b
                ).reshape(n, L, num_heads, dh).transpose(0, 2, 1, 3)

    q = proj(y, params["wq"], params["bq"])
    k = proj(y, params["wk"], params["bk"])
    v = proj(y, params["wv"], params["bv"])

    bias = (1.0 - mask)[:, None, None, :] * (-10000.0)
    s = jnp.einsum("nhqd,nhkd->nhqk", q, k, precision=_HIGHEST) / math.sqrt(dh) + bias
    p = jax.nn.softmax(s, axis=-1)
    ctx = jnp.einsum("nhqk,nhkd->nhqd", p, v, precision=_HIGHEST)
    ctx = ctx.transpose(0, 2, 1, 3).reshape(n, L, H)
    o = jnp.einsum("nlh,hk->nlk", ctx, params["wo"], precision=_HIGHEST) + params["bo"]
    out = ln(o + y, params["ln2_g"], params["ln2_b"])
    return out, jnp.ones((n, L), dtype=desc_query_mask.dtype)


def _init_params(key, din, hidden, max_pos):
    ks = jax.random.split(key, 16)

    def w(k, shape, fan_in):
        return jax.random.normal(k, shape, jnp.float32) / math.sqrt(fan_in)

    def b(k, shape):
        return 0.02 * jax.random.normal(k, shape, jnp.float32)

    return {
        "w_proj": w(ks[0], (din, hidden), din),
        "b_proj": b(ks[1], (1, hidden)),
        "pos_emb": 0.02 * jax.random.normal(ks[2], (max_pos, hidden), jnp.float32),
        "ln1_g": 1.0 + 0.05 * jax.random.normal(ks[3], (1, hidden), jnp.float32),
        "ln1_b": b(ks[4], (1, hidden)),
        "wq": w(ks[5], (hidden, hidden), hidden), "bq": b(ks[6], (1, hidden)),
        "wk": w(ks[7], (hidden, hidden), hidden), "bk": b(ks[8], (1, hidden)),
        "wv": w(ks[9], (hidden, hidden), hidden), "bv": b(ks[10], (1, hidden)),
        "wo": w(ks[11], (hidden, hidden), hidden), "bo": b(ks[12], (1, hidden)),
        "ln2_g": 1.0 + 0.05 * jax.random.normal(ks[13], (1, hidden), jnp.float32),
        "ln2_b": b(ks[14], (1, hidden)),
    }


if __name__ == "__main__":
    key = jax.random.PRNGKey(0)
    k_desc, k_img, k_par = jax.random.split(key, 3)

    N, Lq, Li, Din, H, NH = 2, 8, 8, 32, 32, 4
    MAX_POS = 32

    desc_query = jax.random.normal(k_desc, (N, Lq, Din), jnp.float32)
    image_query = jax.random.normal(k_img, (N, Li, Din), jnp.float32)
    desc_lens = jnp.array([6, 8])
    img_lens = jnp.array([8, 5])
    desc_mask = (jnp.arange(Lq)[None, :] < desc_lens[:, None]).astype(jnp.float32)
    image_mask = (jnp.arange(Li)[None, :] < img_lens[:, None]).astype(jnp.float32)

    params = _init_params(k_par, Din, H, MAX_POS)

    encoder = jax.jit(functools.partial(unified_query_encoder, num_heads=NH))
    out, out_mask = encoder(desc_query, desc_mask, image_query, image_mask, params)
    out = jax.block_until_ready(out)

    ref_out, ref_mask = _reference(desc_query, desc_mask, image_query, image_mask,
                                   params, num_heads=NH)
    assert out.shape == (N, Li + Lq, H)
    np.testing.assert_allclose(np.asarray(out), np.asarray(ref_out), rtol=5e-3, atol=5e-3)
    np.testing.assert_allclose(np.asarray(out_mask), np.asarray(ref_mask))

    print("KERNEL_OK")
</pallas_src>

<mosaic_0001>
module attributes {stable_mosaic.version = 11 : i64} {
  func.func @_uqe_kernel(%arg0: i32, %arg1: memref<1x16x32xf32, #tpu.memory_space<vmem>>, %arg2: memref<1x1x16xf32, #tpu.memory_space<vmem>>, %arg3: memref<32x32xf32, #tpu.memory_space<vmem>>, %arg4: memref<16x32xf32, #tpu.memory_space<vmem>>, %arg5: memref<1x32xf32, #tpu.memory_space<vmem>>, %arg6: memref<1x32xf32, #tpu.memory_space<vmem>>, %arg7: memref<32x96xf32, #tpu.memory_space<vmem>>, %arg8: memref<1x96xf32, #tpu.memory_space<vmem>>, %arg9: memref<32x32xf32, #tpu.memory_space<vmem>>, %arg10: memref<1x32xf32, #tpu.memory_space<vmem>>, %arg11: memref<1x32xf32, #tpu.memory_space<vmem>>, %arg12: memref<1x32xf32, #tpu.memory_space<vmem>>, %arg13: memref<1x16x32xf32, #tpu.memory_space<vmem>>, %arg14: memref<16x32xf32, #tpu.memory_space<vmem>>) attributes {dimension_semantics = [#tpu.dimension_semantics<parallel>], iteration_bounds = array<i64: 2>, scalar_prefetch = 0 : i64, scratch_operands = 1 : i64, tpu.core_type = #tpu.core_type<tc>, window_params = [{transform_indices = @transform_0, window_bounds = array<i64: 1, 16, 32>}, {transform_indices = @transform_1, window_bounds = array<i64: 1, 1, 16>}, {pipeline_mode = #tpu.pipeline_mode<synchronous>, transform_indices = @transform_2, window_bounds = array<i64: 32, 32>}, {pipeline_mode = #tpu.pipeline_mode<synchronous>, transform_indices = @transform_3, window_bounds = array<i64: 16, 32>}, {pipeline_mode = #tpu.pipeline_mode<synchronous>, transform_indices = @transform_4, window_bounds = array<i64: 1, 32>}, {pipeline_mode = #tpu.pipeline_mode<synchronous>, transform_indices = @transform_5, window_bounds = array<i64: 1, 32>}, {pipeline_mode = #tpu.pipeline_mode<synchronous>, transform_indices = @transform_6, window_bounds = array<i64: 32, 96>}, {pipeline_mode = #tpu.pipeline_mode<synchronous>, transform_indices = @transform_7, window_bounds = array<i64: 1, 96>}, {pipeline_mode = #tpu.pipeline_mode<synchronous>, transform_indices = @transform_8, window_bounds = array<i64: 32, 32>}, {pipeline_mode = #tpu.pipeline_mode<synchronous>, transform_indices = @transform_9, window_bounds = array<i64: 1, 32>}, {pipeline_mode = #tpu.pipeline_mode<synchronous>, transform_indices = @transform_10, window_bounds = array<i64: 1, 32>}, {pipeline_mode = #tpu.pipeline_mode<synchronous>, transform_indices = @transform_11, window_bounds = array<i64: 1, 32>}, {transform_indices = @transform_12, window_bounds = array<i64: 1, 16, 32>}]} {
    %c0 = arith.constant 0 : index
    %c0_0 = arith.constant 0 : index
    %c0_1 = arith.constant 0 : index
    %0 = vector.load %arg1[%c0, %c0_0, %c0_1] : memref<1x16x32xf32, #tpu.memory_space<vmem>>, vector<1x16x32xf32>
    %1 = vector.shape_cast %0 : vector<1x16x32xf32> to vector<16x32xf32>
    %c0_2 = arith.constant 0 : index
    %c0_3 = arith.constant 0 : index
    %2 = vector.load %arg3[%c0_2, %c0_3] : memref<32x32xf32, #tpu.memory_space<vmem>>, vector<32x32xf32>
    %cst = arith.constant dense<0.000000e+00> : vector<16x32xf32>
    %3 = tpu.matmul %1, %2, %cst {dimension_numbers = #tpu.dot_dimension_numbers<[1], [0], [0], [1], [0, 0, 1, 1], [], []>, precision = #tpu.contract_precision<fp32>} : vector<16x32xf32>, vector<32x32xf32>, vector<16x32xf32> -> vector<16x32xf32>
    %c0_4 = arith.constant 0 : index
    %c0_5 = arith.constant 0 : index
    %4 = vector.load %arg4[%c0_4, %c0_5] : memref<16x32xf32, #tpu.memory_space<vmem>>, vector<16x32xf32>
    %5 = arith.addf %3, %4 : vector<16x32xf32>
    %c0_6 = arith.constant 0 : index
    %c0_7 = arith.constant 0 : index
    %6 = vector.load %arg5[%c0_6, %c0_7] : memref<1x32xf32, #tpu.memory_space<vmem>>, vector<1x32xf32>
    %c0_8 = arith.constant 0 : index
    %c0_9 = arith.constant 0 : index
    %7 = vector.load %arg6[%c0_8, %c0_9] : memref<1x32xf32, #tpu.memory_space<vmem>>, vector<1x32xf32>
    %cst_10 = arith.constant dense<0.000000e+00> : vector<16xf32>
    %8 = vector.multi_reduction <add>, %5, %cst_10 [1] : vector<16x32xf32> to vector<16xf32>
    %9 = vector.shape_cast %8 : vector<16xf32> to vector<16x1xf32>
    %cst_11 = arith.constant 3.200000e+01 : f32
    %10 = vector.broadcast %cst_11 : f32 to vector<16x1xf32>
    %11 = arith.divf %9, %10 : vector<16x1xf32>
    %12 = vector.broadcast %11 : vector<16x1xf32> to vector<16x32xf32>
    %13 = arith.subf %5, %12 : vector<16x32xf32>
    %14 = arith.mulf %13, %13 : vector<16x32xf32>
    %cst_12 = arith.constant dense<0.000000e+00> : vector<16xf32>
    %15 = vector.multi_reduction <add>, %14, %cst_12 [1] : vector<16x32xf32> to vector<16xf32>
    %16 = vector.shape_cast %15 : vector<16xf32> to vector<16x1xf32>
    %cst_13 = arith.constant 3.200000e+01 : f32
    %17 = vector.broadcast %cst_13 : f32 to vector<16x1xf32>
    %18 = arith.divf %16, %17 : vector<16x1xf32>
    %cst_14 = arith.constant 9.99999974E-6 : f32
    %19 = vector.broadcast %cst_14 : f32 to vector<16x1xf32>
    %20 = arith.addf %18, %19 : vector<16x1xf32>
    %21 = math.rsqrt %20 : vector<16x1xf32>
    %22 = vector.broadcast %21 : vector<16x1xf32> to vector<16x32xf32>
    %23 = arith.mulf %13, %22 : vector<16x32xf32>
    %24 = vector.broadcast %6 : vector<1x32xf32> to vector<16x32xf32>
    %25 = arith.mulf %23, %24 : vector<16x32xf32>
    %26 = vector.broadcast %7 : vector<1x32xf32> to vector<16x32xf32>
    %27 = arith.addf %25, %26 : vector<16x32xf32>
    %c0_15 = arith.constant 0 : index
    %c0_16 = arith.constant 0 : index
    %28 = vector.load %arg7[%c0_15, %c0_16] : memref<32x96xf32, #tpu.memory_space<vmem>>, vector<32x96xf32>
    %cst_17 = arith.constant dense<0.000000e+00> : vector<16x96xf32>
    %29 = tpu.matmul %27, %28, %cst_17 {dimension_numbers = #tpu.dot_dimension_numbers<[1], [0], [0], [1], [0, 0, 1, 1], [], []>, precision = #tpu.contract_precision<fp32>} : vector<16x32xf32>, vector<32x96xf32>, vector<16x96xf32> -> vector<16x96xf32>
    %c0_18 = arith.constant 0 : index
    %c0_19 = arith.constant 0 : index
    %30 = vector.load %arg8[%c0_18, %c0_19] : memref<1x96xf32, #tpu.memory_space<vmem>>, vector<1x96xf32>
    %31 = vector.broadcast %30 : vector<1x96xf32> to vector<16x96xf32>
    %32 = arith.addf %29, %31 : vector<16x96xf32>
    %33 = vector.extract_strided_slice %32 {offsets = [0, 0], sizes = [16, 32], strides = [1, 1]} : vector<16x96xf32> to vector<16x32xf32>
    %34 = vector.extract_strided_slice %32 {offsets = [0, 32], sizes = [16, 32], strides = [1, 1]} : vector<16x96xf32> to vector<16x32xf32>
    %35 = vector.extract_strided_slice %32 {offsets = [0, 64], sizes = [16, 32], strides = [1, 1]} : vector<16x96xf32> to vector<16x32xf32>
    %c0_20 = arith.constant 0 : index
    %c0_21 = arith.constant 0 : index
    %c0_22 = arith.constant 0 : index
    %36 = vector.load %arg2[%c0_20, %c0_21, %c0_22] : memref<1x1x16xf32, #tpu.memory_space<vmem>>, vector<1x1x16xf32>
    %37 = vector.shape_cast %36 : vector<1x1x16xf32> to vector<1x16xf32>
    %cst_23 = arith.constant 1.000000e+00 : f32
    %38 = vector.broadcast %cst_23 : f32 to vector<1x16xf32>
    %39 = arith.subf %38, %37 : vector<1x16xf32>
    %cst_24 = arith.constant -1.000000e+04 : f32
    %40 = vector.broadcast %cst_24 : f32 to vector<1x16xf32>
    %41 = arith.mulf %39, %40 : vector<1x16xf32>
    %42 = vector.extract_strided_slice %33 {offsets = [0, 0], sizes = [16, 8], strides = [1, 1]} : vector<16x32xf32> to vector<16x8xf32>
    %43 = vector.extract_strided_slice %34 {offsets = [0, 0], sizes = [16, 8], strides = [1, 1]} : vector<16x32xf32> to vector<16x8xf32>
    %44 = vector.extract_strided_slice %35 {offsets = [0, 0], sizes = [16, 8], strides = [1, 1]} : vector<16x32xf32> to vector<16x8xf32>
    %cst_25 = arith.constant dense<0.000000e+00> : vector<16x16xf32>
    %45 = tpu.matmul %42, %43, %cst_25 {dimension_numbers = #tpu.dot_dimension_numbers<[1], [1], [0], [0], [0, 0, 1, 0], [], []>, precision = #tpu.contract_precision<fp32>} : vector<16x8xf32>, vector<16x8xf32>, vector<16x16xf32> -> vector<16x16xf32>
    %cst_26 = arith.constant 0.353553385 : f32
    %46 = vector.broadcast %cst_26 : f32 to vector<16x16xf32>
    %47 = arith.mulf %45, %46 : vector<16x16xf32>
    %48 = vector.broadcast %41 : vector<1x16xf32> to vector<16x16xf32>
    %49 = arith.addf %47, %48 : vector<16x16xf32>
    %cst_27 = arith.constant dense<0xFF800000> : vector<16xf32>
    %50 = vector.multi_reduction <maximumf>, %49, %cst_27 [1] : vector<16x16xf32> to vector<16xf32>
    %51 = vector.shape_cast %50 : vector<16xf32> to vector<16x1xf32>
    %52 = vector.broadcast %51 : vector<16x1xf32> to vector<16x16xf32>
    %53 = arith.subf %49, %52 : vector<16x16xf32>
    %54 = math.exp %53 : vector<16x16xf32>
    %cst_28 = arith.constant dense<0.000000e+00> : vector<16xf32>
    %55 = vector.multi_reduction <add>, %54, %cst_28 [1] : vector<16x16xf32> to vector<16xf32>
    %56 = vector.shape_cast %55 : vector<16xf32> to vector<16x1xf32>
    %57 = vector.broadcast %56 : vector<16x1xf32> to vector<16x16xf32>
    %58 = arith.divf %54, %57 : vector<16x16xf32>
    %cst_29 = arith.constant dense<0.000000e+00> : vector<16x8xf32>
    %59 = tpu.matmul %58, %44, %cst_29 {dimension_numbers = #tpu.dot_dimension_numbers<[1], [0], [0], [1], [0, 0, 1, 1], [], []>, precision = #tpu.contract_precision<fp32>} : vector<16x16xf32>, vector<16x8xf32>, vector<16x8xf32> -> vector<16x8xf32>
    %c0_30 = arith.constant 0 : index
    %c0_31 = arith.constant 0 : index
    %60 = vector.load %arg14[%c0_30, %c0_31] : memref<16x32xf32, #tpu.memory_space<vmem>>, vector<16x8xf32>
    tpu.vector_store %arg14[%c0_30, %c0_31], %59 {strides = array<i32>} : memref<16x32xf32, #tpu.memory_space<vmem>>, vector<16x8xf32>,
    %61 = vector.extract_strided_slice %33 {offsets = [0, 8], sizes = [16, 8], strides = [1, 1]} : vector<16x32xf32> to vector<16x8xf32>
    %62 = vector.extract_strided_slice %34 {offsets = [0, 8], sizes = [16, 8], strides = [1, 1]} : vector<16x32xf32> to vector<16x8xf32>
    %63 = vector.extract_strided_slice %35 {offsets = [0, 8], sizes = [16, 8], strides = [1, 1]} : vector<16x32xf32> to vector<16x8xf32>
    %cst_32 = arith.constant dense<0.000000e+00> : vector<16x16xf32>
    %64 = tpu.matmul %61, %62, %cst_32 {dimension_numbers = #tpu.dot_dimension_numbers<[1], [1], [0], [0], [0, 0, 1, 0], [], []>, precision = #tpu.contract_precision<fp32>} : vector<16x8xf32>, vector<16x8xf32>, vector<16x16xf32> -> vector<16x16xf32>
    %cst_33 = arith.constant 0.353553385 : f32
    %65 = vector.broadcast %cst_33 : f32 to vector<16x16xf32>
    %66 = arith.mulf %64, %65 : vector<16x16xf32>
    %67 = vector.broadcast %41 : vector<1x16xf32> to vector<16x16xf32>
    %68 = arith.addf %66, %67 : vector<16x16xf32>
    %cst_34 = arith.constant dense<0xFF800000> : vector<16xf32>
    %69 = vector.multi_reduction <maximumf>, %68, %cst_34 [1] : vector<16x16xf32> to vector<16xf32>
    %70 = vector.shape_cast %69 : vector<16xf32> to vector<16x1xf32>
    %71 = vector.broadcast %70 : vector<16x1xf32> to vector<16x16xf32>
    %72 = arith.subf %68, %71 : vector<16x16xf32>
    %73 = math.exp %72 : vector<16x16xf32>
    %cst_35 = arith.constant dense<0.000000e+00> : vector<16xf32>
    %74 = vector.multi_reduction <add>, %73, %cst_35 [1] : vector<16x16xf32> to vector<16xf32>
    %75 = vector.shape_cast %74 : vector<16xf32> to vector<16x1xf32>
    %76 = vector.broadcast %75 : vector<16x1xf32> to vector<16x16xf32>
    %77 = arith.divf %73, %76 : vector<16x16xf32>
    %cst_36 = arith.constant dense<0.000000e+00> : vector<16x8xf32>
    %78 = tpu.matmul %77, %63, %cst_36 {dimension_numbers = #tpu.dot_dimension_numbers<[1], [0], [0], [1], [0, 0, 1, 1], [], []>, precision = #tpu.contract_precision<fp32>} : vector<16x16xf32>, vector<16x8xf32>, vector<16x8xf32> -> vector<16x8xf32>
    %c0_37 = arith.constant 0 : index
    %c8 = arith.constant 8 : index
    %79 = vector.load %arg14[%c0_37, %c8] : memref<16x32xf32, #tpu.memory_space<vmem>>, vector<16x8xf32>
    tpu.vector_store %arg14[%c0_37, %c8], %78 {strides = array<i32>} : memref<16x32xf32, #tpu.memory_space<vmem>>, vector<16x8xf32>,
    %80 = vector.extract_strided_slice %33 {offsets = [0, 16], sizes = [16, 8], strides = [1, 1]} : vector<16x32xf32> to vector<16x8xf32>
    %81 = vector.extract_strided_slice %34 {offsets = [0, 16], sizes = [16, 8], strides = [1, 1]} : vector<16x32xf32> to vector<16x8xf32>
    %82 = vector.extract_strided_slice %35 {offsets = [0, 16], sizes = [16, 8], strides = [1, 1]} : vector<16x32xf32> to vector<16x8xf32>
    %cst_38 = arith.constant dense<0.000000e+00> : vector<16x16xf32>
    %83 = tpu.matmul %80, %81, %cst_38 {dimension_numbers = #tpu.dot_dimension_numbers<[1], [1], [0], [0], [0, 0, 1, 0], [], []>, precision = #tpu.contract_precision<fp32>} : vector<16x8xf32>, vector<16x8xf32>, vector<16x16xf32> -> vector<16x16xf32>
    %cst_39 = arith.constant 0.353553385 : f32
    %84 = vector.broadcast %cst_39 : f32 to vector<16x16xf32>
    %85 = arith.mulf %83, %84 : vector<16x16xf32>
    %86 = vector.broadcast %41 : vector<1x16xf32> to vector<16x16xf32>
    %87 = arith.addf %85, %86 : vector<16x16xf32>
    %cst_40 = arith.constant dense<0xFF800000> : vector<16xf32>
    %88 = vector.multi_reduction <maximumf>, %87, %cst_40 [1] : vector<16x16xf32> to vector<16xf32>
    %89 = vector.shape_cast %88 : vector<16xf32> to vector<16x1xf32>
    %90 = vector.broadcast %89 : vector<16x1xf32> to vector<16x16xf32>
    %91 = arith.subf %87, %90 : vector<16x16xf32>
    %92 = math.exp %91 : vector<16x16xf32>
    %cst_41 = arith.constant dense<0.000000e+00> : vector<16xf32>
    %93 = vector.multi_reduction <add>, %92, %cst_41 [1] : vector<16x16xf32> to vector<16xf32>
    %94 = vector.shape_cast %93 : vector<16xf32> to vector<16x1xf32>
    %95 = vector.broadcast %94 : vector<16x1xf32> to vector<16x16xf32>
    %96 = arith.divf %92, %95 : vector<16x16xf32>
    %cst_42 = arith.constant dense<0.000000e+00> : vector<16x8xf32>
    %97 = tpu.matmul %96, %82, %cst_42 {dimension_numbers = #tpu.dot_dimension_numbers<[1], [0], [0], [1], [0, 0, 1, 1], [], []>, precision = #tpu.contract_precision<fp32>} : vector<16x16xf32>, vector<16x8xf32>, vector<16x8xf32> -> vector<16x8xf32>
    %c0_43 = arith.constant 0 : index
    %c16 = arith.constant 16 : index
    %98 = vector.load %arg14[%c0_43, %c16] : memref<16x32xf32, #tpu.memory_space<vmem>>, vector<16x8xf32>
    tpu.vector_store %arg14[%c0_43, %c16], %97 {strides = array<i32>} : memref<16x32xf32, #tpu.memory_space<vmem>>, vector<16x8xf32>,
    %99 = vector.extract_strided_slice %33 {offsets = [0, 24], sizes = [16, 8], strides = [1, 1]} : vector<16x32xf32> to vector<16x8xf32>
    %100 = vector.extract_strided_slice %34 {offsets = [0, 24], sizes = [16, 8], strides = [1, 1]} : vector<16x32xf32> to vector<16x8xf32>
    %101 = vector.extract_strided_slice %35 {offsets = [0, 24], sizes = [16, 8], strides = [1, 1]} : vector<16x32xf32> to vector<16x8xf32>
    %cst_44 = arith.constant dense<0.000000e+00> : vector<16x16xf32>
    %102 = tpu.matmul %99, %100, %cst_44 {dimension_numbers = #tpu.dot_dimension_numbers<[1], [1], [0], [0], [0, 0, 1, 0], [], []>, precision = #tpu.contract_precision<fp32>} : vector<16x8xf32>, vector<16x8xf32>, vector<16x16xf32> -> vector<16x16xf32>
    %cst_45 = arith.constant 0.353553385 : f32
    %103 = vector.broadcast %cst_45 : f32 to vector<16x16xf32>
    %104 = arith.mulf %102, %103 : vector<16x16xf32>
    %105 = vector.broadcast %41 : vector<1x16xf32> to vector<16x16xf32>
    %106 = arith.addf %104, %105 : vector<16x16xf32>
    %cst_46 = arith.constant dense<0xFF800000> : vector<16xf32>
    %107 = vector.multi_reduction <maximumf>, %106, %cst_46 [1] : vector<16x16xf32> to vector<16xf32>
    %108 = vector.shape_cast %107 : vector<16xf32> to vector<16x1xf32>
    %109 = vector.broadcast %108 : vector<16x1xf32> to vector<16x16xf32>
    %110 = arith.subf %106, %109 : vector<16x16xf32>
    %111 = math.exp %110 : vector<16x16xf32>
    %cst_47 = arith.constant dense<0.000000e+00> : vector<16xf32>
    %112 = vector.multi_reduction <add>, %111, %cst_47 [1] : vector<16x16xf32> to vector<16xf32>
    %113 = vector.shape_cast %112 : vector<16xf32> to vector<16x1xf32>
    %114 = vector.broadcast %113 : vector<16x1xf32> to vector<16x16xf32>
    %115 = arith.divf %111, %114 : vector<16x16xf32>
    %cst_48 = arith.constant dense<0.000000e+00> : vector<16x8xf32>
    %116 = tpu.matmul %115, %101, %cst_48 {dimension_numbers = #tpu.dot_dimension_numbers<[1], [0], [0], [1], [0, 0, 1, 1], [], []>, precision = #tpu.contract_precision<fp32>} : vector<16x16xf32>, vector<16x8xf32>, vector<16x8xf32> -> vector<16x8xf32>
    %c0_49 = arith.constant 0 : index
    %c24 = arith.constant 24 : index
    %117 = vector.load %arg14[%c0_49, %c24] : memref<16x32xf32, #tpu.memory_space<vmem>>, vector<16x8xf32>
    tpu.vector_store %arg14[%c0_49, %c24], %116 {strides = array<i32>} : memref<16x32xf32, #tpu.memory_space<vmem>>, vector<16x8xf32>,
    %c0_50 = arith.constant 0 : index
    %c0_51 = arith.constant 0 : index
    %118 = vector.load %arg14[%c0_50, %c0_51] : memref<16x32xf32, #tpu.memory_space<vmem>>, vector<16x32xf32>
    %c0_52 = arith.constant 0 : index
    %c0_53 = arith.constant 0 : index
    %119 = vector.load %arg9[%c0_52, %c0_53] : memref<32x32xf32, #tpu.memory_space<vmem>>, vector<32x32xf32>
    %cst_54 = arith.constant dense<0.000000e+00> : vector<16x32xf32>
    %120 = tpu.matmul %118, %119, %cst_54 {dimension_numbers = #tpu.dot_dimension_numbers<[1], [0], [0], [1], [0, 0, 1, 1], [], []>, precision = #tpu.contract_precision<fp32>} : vector<16x32xf32>, vector<32x32xf32>, vector<16x32xf32> -> vector<16x32xf32>
    %c0_55 = arith.constant 0 : index
    %c0_56 = arith.constant 0 : index
    %121 = vector.load %arg10[%c0_55, %c0_56] : memref<1x32xf32, #tpu.memory_space<vmem>>, vector<1x32xf32>
    %122 = vector.broadcast %121 : vector<1x32xf32> to vector<16x32xf32>
    %123 = arith.addf %120, %122 : vector<16x32xf32>
    %124 = arith.addf %123, %27 : vector<16x32xf32>
    %c0_57 = arith.constant 0 : index
    %c0_58 = arith.constant 0 : index
    %125 = vector.load %arg11[%c0_57, %c0_58] : memref<1x32xf32, #tpu.memory_space<vmem>>, vector<1x32xf32>
    %c0_59 = arith.constant 0 : index
    %c0_60 = arith.constant 0 : index
    %126 = vector.load %arg12[%c0_59, %c0_60] : memref<1x32xf32, #tpu.memory_space<vmem>>, vector<1x32xf32>
    %cst_61 = arith.constant dense<0.000000e+00> : vector<16xf32>
    %127 = vector.multi_reduction <add>, %124, %cst_61 [1] : vector<16x32xf32> to vector<16xf32>
    %128 = vector.shape_cast %127 : vector<16xf32> to vector<16x1xf32>
    %cst_62 = arith.constant 3.200000e+01 : f32
    %129 = vector.broadcast %cst_62 : f32 to vector<16x1xf32>
    %130 = arith.divf %128, %129 : vector<16x1xf32>
    %131 = vector.broadcast %130 : vector<16x1xf32> to vector<16x32xf32>
    %132 = arith.subf %124, %131 : vector<16x32xf32>
    %133 = arith.mulf %132, %132 : vector<16x32xf32>
    %cst_63 = arith.constant dense<0.000000e+00> : vector<16xf32>
    %134 = vector.multi_reduction <add>, %133, %cst_63 [1] : vector<16x32xf32> to vector<16xf32>
    %135 = vector.shape_cast %134 : vector<16xf32> to vector<16x1xf32>
    %cst_64 = arith.constant 3.200000e+01 : f32
    %136 = vector.broadcast %cst_64 : f32 to vector<16x1xf32>
    %137 = arith.divf %135, %136 : vector<16x1xf32>
    %cst_65 = arith.constant 9.99999974E-6 : f32
    %138 = vector.broadcast %cst_65 : f32 to vector<16x1xf32>
    %139 = arith.addf %137, %138 : vector<16x1xf32>
    %140 = math.rsqrt %139 : vector<16x1xf32>
    %141 = vector.broadcast %140 : vector<16x1xf32> to vector<16x32xf32>
    %142 = arith.mulf %132, %141 : vector<16x32xf32>
    %143 = vector.broadcast %125 : vector<1x32xf32> to vector<16x32xf32>
    %144 = arith.mulf %142, %143 : vector<16x32xf32>
    %145 = vector.broadcast %126 : vector<1x32xf32> to vector<16x32xf32>
    %146 = arith.addf %144, %145 : vector<16x32xf32>
    %c0_66 = arith.constant 0 : index
    %c0_67 = arith.constant 0 : index
    %c0_68 = arith.constant 0 : index
    %147 = vector.load %arg13[%c0_66, %c0_67, %c0_68] : memref<1x16x32xf32, #tpu.memory_space<vmem>>, vector<1x16x32xf32>
    %148 = vector.shape_cast %147 : vector<1x16x32xf32> to vector<16x32xf32>
    %149 = vector.shape_cast %146 : vector<16x32xf32> to vector<1x16x32xf32>
    tpu.vector_store %arg13[%c0_66, %c0_67, %c0_68], %149 {strides = array<i32>} : memref<1x16x32xf32, #tpu.memory_space<vmem>>, vector<1x16x32xf32>,
    return
  }
  func.func @transform_0(%arg0: i32) -> (i32, i32, i32) {
    %c0_i32 = arith.constant 0 : i32
    %c0_i32_0 = arith.constant 0 : i32
    %c0_i32_1 = arith.constant 0 : i32
    return %arg0, %c0_i32, %c0_i32_0 : i32, i32, i32
  }
  func.func @transform_1(%arg0: i32) -> (i32, i32, i32) {
    %c0_i32 = arith.constant 0 : i32
    %c0_i32_0 = arith.constant 0 : i32
    %c0_i32_1 = arith.constant 0 : i32
    return %arg0, %c0_i32, %c0_i32_0 : i32, i32, i32
  }
  func.func @transform_2(%arg0: i32) -> (i32, i32) {
    %c0_i32 = arith.constant 0 : i32
    %c0_i32_0 = arith.constant 0 : i32
    %c0_i32_1 = arith.constant 0 : i32
    return %c0_i32, %c0_i32_0 : i32, i32
  }
  func.func @transform_3(%arg0: i32) -> (i32, i32) {
    %c0_i32 = arith.constant 0 : i32
    %c0_i32_0 = arith.constant 0 : i32
    %c0_i32_1 = arith.constant 0 : i32
    return %c0_i32, %c0_i32_0 : i32, i32
  }
  func.func @transform_4(%arg0: i32) -> (i32, i32) {
    %c0_i32 = arith.constant 0 : i32
    %c0_i32_0 = arith.constant 0 : i32
    %c0_i32_1 = arith.constant 0 : i32
    return %c0_i32, %c0_i32_0 : i32, i32
  }
  func.func @transform_5(%arg0: i32) -> (i32, i32) {
    %c0_i32 = arith.constant 0 : i32
    %c0_i32_0 = arith.constant 0 : i32
    %c0_i32_1 = arith.constant 0 : i32
    return %c0_i32, %c0_i32_0 : i32, i32
  }
  func.func @transform_6(%arg0: i32) -> (i32, i32) {
    %c0_i32 = arith.constant 0 : i32
    %c0_i32_0 = arith.constant 0 : i32
    %c0_i32_1 = arith.constant 0 : i32
    return %c0_i32, %c0_i32_0 : i32, i32
  }
  func.func @transform_7(%arg0: i32) -> (i32, i32) {
    %c0_i32 = arith.constant 0 : i32
    %c0_i32_0 = arith.constant 0 : i32
    %c0_i32_1 = arith.constant 0 : i32
    return %c0_i32, %c0_i32_0 : i32, i32
  }
  func.func @transform_8(%arg0: i32) -> (i32, i32) {
    %c0_i32 = arith.constant 0 : i32
    %c0_i32_0 = arith.constant 0 : i32
    %c0_i32_1 = arith.constant 0 : i32
    return %c0_i32, %c0_i32_0 : i32, i32
  }
  func.func @transform_9(%arg0: i32) -> (i32, i32) {
    %c0_i32 = arith.constant 0 : i32
    %c0_i32_0 = arith.constant 0 : i32
    %c0_i32_1 = arith.constant 0 : i32
    return %c0_i32, %c0_i32_0 : i32, i32
  }
  func.func @transform_10(%arg0: i32) -> (i32, i32) {
    %c0_i32 = arith.constant 0 : i32
    %c0_i32_0 = arith.constant 0 : i32
    %c0_i32_1 = arith.constant 0 : i32
    return %c0_i32, %c0_i32_0 : i32, i32
  }
  func.func @transform_11(%arg0: i32) -> (i32, i32) {
    %c0_i32 = arith.constant 0 : i32
    %c0_i32_0 = arith.constant 0 : i32
    %c0_i32_1 = arith.constant 0 : i32
    return %c0_i32, %c0_i32_0 : i32, i32
  }
  func.func @transform_12(%arg0: i32) -> (i32, i32, i32) {
    %c0_i32 = arith.constant 0 : i32
    %c0_i32_0 = arith.constant 0 : i32
    %c0_i32_1 = arith.constant 0 : i32
    return %arg0, %c0_i32, %c0_i32_0 : i32, i32, i32
  }
}

</mosaic_0001>

<bundles_post_ra>
// kernel: unified_query_encoder.1
= control target key start
LH: loop header
LB: loop body
LE: loop exit
PB: predicated region body
PF: predicated region fallthrough
CT: control target
= control target key end

     0   :  { %s8371_s0 = inlined_call_operand.vmem [shape: f32[2,16,32], index: 0, kind: input, shape index: {}]   ;;  %s8372_s1 = inlined_call_operand.vmem [shape: f32[2,1,16], index: 1, kind: input, shape index: {}]   ;;  %s8373_s2 = inlined_call_operand.vmem [shape: f32[32,32], index: 2, kind: input, shape index: {}]   ;;  %s8374_s3 = inlined_call_operand.vmem [shape: f32[16,32], index: 3, kind: input, shape index: {}]   ;;  %s8375_s4 = inlined_call_operand.vmem [shape: f32[1,32], index: 4, kind: input, shape index: {}]   ;;  %s8376_s5 = inlined_call_operand.vmem [shape: f32[1,32], index: 5, kind: input, shape index: {}]   ;;  %s8377_s6 = inlined_call_operand.vmem [shape: f32[32,96], index: 6, kind: input, shape index: {}]   ;;  %s8378_s7 = inlined_call_operand.vmem [shape: f32[1,96], index: 7, kind: input, shape index: {}]   ;;  %s8379_s8 = inlined_call_operand.vmem [shape: f32[32,32], index: 8, kind: input, shape index: {}]   ;;  %s8380_s9 = inlined_call_operand.vmem [shape: f32[1,32], index: 9, kind: input, shape index: {}]   ;;  %s8381_s10 = inlined_call_operand.vmem [shape: f32[1,32], index: 10, kind: input, shape index: {}]   ;;  %s8382_s11 = inlined_call_operand.vmem [shape: f32[1,32], index: 11, kind: input, shape index: {}]   ;;  %s8383_s12 = inlined_call_operand.hbm [shape: f32[2,16,32], index: 12, kind: output, shape index: {}]  }
   0x1   :  { %8385 = sst [smem:[#allocation6_spill]] %s8371_s0 }
   0x2   :  { %8386 = sst [smem:[#allocation7_spill]] %s8372_s1 }
   0x3   :  { %17 = vsyncpa [#allocation4], 0 }
   0x4   :  { %19 = vsyncpa [#allocation4 + $0x1], 0  ;;  %s7606_s21 = smov 0   ;;  %s7608_s22 = smov 0  }
   0x5   :  { %s7610_s23 = smov 0   ;;  %s7612_s24 = smov 0  }
   0x6 LB: > { %s7627_s25 = sadd.s32 4294967295, %s7523_s24   ;;  %s6515_s26 = sadd.s32 4294967294, %s7523_s24   ;;  %s7523_s24 = sphi %s7612_s24, %s8395_s24   ;;  %s7519_s23 = sphi %s7610_s23, %s8394_s23   ;;  %s7515_s22 = sphi %s7608_s22, %s8393_s22   ;;  %s7511_s21 = sphi %s7606_s21, %s8392_s21  }
   0x7   : > { %s7631_s27 = sadd.s32 1, %s7523_s24   ;;  %s294_s28 = sadd.s32 1, %s7519_s23 }
   0x8   : > { %s291_s29 = ssub.s32 %s7523_s24, %s7631_s27  ;;  %p304_p0 = scmp.ne.s32.totalorder %s7519_s23, %s7515_s22 }
   0x9   : > { %p292_p1 = scmp.eq.s32.totalorder %s291_s29, 0  ;;  %p305_p2 = scmp.eq.s32.totalorder %s7627_s25, 1 }
   0xa   : > { %p310_p3 = scmp.ne.s32.totalorder %s7515_s22, %s7511_s21  ;;  %p311_p4 = scmp.eq.s32.totalorder %s6515_s26, 1 }
   0xb   : > { %s7642_s30 = scalar_select %p292_p1, %s7519_s23, %s294_s28  }
   0xc   : > { %p7644_p5 = por %p305_p2, %p304_p0  ;;  %p7648_p6 = por %p311_p4, %p310_p3 }
   0xd   : > { %p6518_p7 = scmp.ge.s32.totalorder %s7523_s24, 1  ;;  %p373_p8 = scmp.lt.s32.totalorder %s7523_s24, 3 }
   0xf   : > { %p374_p9 = pnand %p6518_p7, %p373_p8 }
  0x10   : > { %p418_p10 = scmp.lt.s32.totalorder (!%p374_p9), %s7627_s25, 1  ;;  %s8389_s0 = sld [smem:[#allocation6_spill]] (!%p374_p9) }
  0x11   : > { %377 = sbr.rel (%p374_p9) target bundleno = 4046 (0xfce), region = 68  ;;  %s7525_s26 = smov (!%p374_p9), 96  }
  0x12   : > { %s8390_s1 = sld [smem:[#allocation7_spill]] (!%p374_p9)  ;;  %s7527_s17 = smov (!%p374_p9), 88  }
  0x13   : > { %s7529_s19 = smov (!%p374_p9), 56   ;;  %s7530_s20 = smov (!%p374_p9), 80  }
  0x14   : > { %s7532_s28 = smov (!%p374_p9), 48  }
  0x16   : > { %v431_v0 = vld [vmem:[%s8373_s2 + $0x18] sm:$0xff]  ;;  %v430_v1 = vld [vmem:[%s8373_s2 + $0x10] sm:$0xff]  ;;  %v429_v2 = vld [vmem:[%s8373_s2 + $0x8] sm:$0xff]  ;;  %s7676_s29 = scalar_select %p418_p10, %s7627_s25, 1  ;;  %vm434_vm0 = vcmask 261120   ;;  %vm1568_vm1 = vcmask 64512  }
  0x17   : > { %v7664_v3 = vand.u32 4294901760, %v431_v0  ;;  %v7666_v4 = vand.u32 4294901760, %v430_v1  ;;  %v7668_v5 = vand.u32 4294901760, %v429_v2  ;;  %v428_v6 = vld [vmem:[%s8373_s2] sm:$0xff]  ;;  %v433_v39 = vld [vmem:[%s8374_s3 + $0x8] sm:$0xff]  ;;  %vm2089_vm2 = vcmask 130048  }
  0x18   : > { %v7673_v7 = vand.u32 4294901760, %v428_v6  ;;  %s6533_s15 = sshll.u32 %s7676_s29, 4  ;;  %v432_v42 = vld [vmem:[%s8374_s3] sm:$0xff]  ;;  %s425_s16 = scalar_lea.vmem %s8390_s1, %s7676_s29  ;;  %vm3694_vm3 = vcmask 130112   ;;  %vm4763_vm4 = vcmask 195712   ;;  %vm5832_vm5 = vcmask 261312  }
  0x19   : > { %6835 = vmatprep.subr.mxu0 %v7664_v3  ;;  %v556_v8 = vsub.f32 %v431_v0, %v7664_v3  ;;  %v563_v9 = vsub.f32 %v430_v1, %v7666_v4  ;;  %v570_v10 = vsub.f32 %v429_v2, %v7668_v5  ;;  %s422_s18 = scalar_lea.vmem %s8389_s0, %s6533_s15  ;;  %s7526_s29 = smov 64  }
  0x1a   : > { %6836 = vmatpush3.msra.mxu0 %v7664_v3  ;;  %v577_v11 = vsub.f32 %v428_v6, %v7673_v7  ;;  %v426_v16 = vld [vmem:[%s422_s18] sm:$0xff]  ;;  %v427_v17 = vld [vmem:[%s422_s18 + $0x8] sm:$0xff]  ;;  %s7528_s18 = smov 120   ;;  %s7533_s15 = smov 72  }
  0x1b   : > { %v7685_v12 = vand.u32 4294901760, %v556_v8  ;;  %6837 = vmatprep.subr.mxu0 %v7666_v4  ;;  %v7688_v13 = vand.u32 4294901760, %v563_v9  ;;  %v7690_v14 = vand.u32 4294901760, %v570_v10  ;;  %v436_v21 = vsel %vm434_vm0, %v426_v16, 0 }
  0x1c   : > { %6838 = vmatpush3.msra.mxu0 %v7666_v4  ;;  %v7696_v15 = vand.u32 4294901760, %v577_v11  ;;  %v7704_v22 = vand.u32 4294901760, %v436_v21  ;;  %v439_v23 = vsel %vm434_vm0, %v427_v17, 0 }
  0x1d   : > { %v558_v18 = vsub.f32 %v556_v8, %v7685_v12  ;;  %v565_v19 = vsub.f32 %v563_v9, %v7688_v13  ;;  %6839 = vmatprep.subr.mxu0 %v7668_v5  ;;  %v572_v20 = vsub.f32 %v570_v10, %v7690_v14  ;;  %v520_v27 = vand.u32 4294901760, %v439_v23 }
  0x1e   : > { %6840 = vmatpush3.msra.mxu0 %v7668_v5  ;;  %v579_v26 = vsub.f32 %v577_v11, %v7696_v15  ;;  %v511_v28 = vsub.f32 %v436_v21, %v7704_v22  ;;  %6854 = vmatprep.mubr.f32.mxu1 %v7704_v22 }
  0x1f   : > { %v559_v24 = vand.u32 4294901760, %v558_v18  ;;  %v566_v25 = vand.u32 4294901760, %v565_v19  ;;  %6841 = vmatprep.subr.mxu0 %v7673_v7  ;;  %v573_v29 = vand.u32 4294901760, %v572_v20  ;;  %v521_v30 = vsub.f32 %v439_v23, %v520_v27 }
  0x20   : > { %6842 = vmatpush3.msra.mxu0 %v7673_v7  ;;  %v512_v31 = vand.u32 4294901760, %v511_v28  ;;  %v580_v32 = vand.u32 4294901760, %v579_v26 }
  0x21   : > { %6846 = vmatprep.subr.mxu1 %v559_v24  ;;  %6857 = vmatprep.subr.mxu0 %v556_v8  ;;  %v522_v33 = vand.u32 4294901760, %v521_v30 }
  0x22   : > { %6847 = vmatpush3.msra.mxu1 %v559_v24  ;;  %v513_v34 = vsub.f32 %v511_v28, %v512_v31 }
  0x23   : > { %6848 = vmatprep.subr.mxu1 %v566_v25  ;;  %v523_v35 = vsub.f32 %v521_v30, %v522_v33 }
  0x24   : > { %6849 = vmatpush3.msra.mxu1 %v566_v25  ;;  %v514_v36 = vand.u32 4294901760, %v513_v34 }
  0x25   : > { %6850 = vmatprep.subr.mxu1 %v573_v29  ;;  %v524_v37 = vand.u32 4294901760, %v523_v35 }
  0x26   : > { %6851 = vmatpush3.msra.mxu1 %v573_v29  ;;  %6843 = vmatprep.mubr.f32.mxu0 %v514_v36  ;;  %v1014_v29 = vld [vmem:[%s8377_s6] sm:$0xff] }
  0x27   : > { %6852 = vmatprep.subr.mxu1 %v580_v32  ;;  %6844 = vmatmul.mubr.f32.vlgmr.msra.gmra.mxu0 %v524_v37 }
  0x28   : > { %6853 = vmatpush3.msra.mxu1 %v580_v32  ;;  %6858 = vmatpush3.msra.mxu0 %v556_v8 }
  0x29   : > { %6855 = vmatmul.mubr.f32.vlgmr.msra.gmra.mxu1 %v520_v27  ;;  %6868 = vmatprep.subr.mxu1 %v7664_v3 }
  0x2a   : > { %6859 = vmatprep.subr.mxu0 %v563_v9  ;;  %6869 = vmatpush3.msra.mxu1 %v7664_v3 }
  0x2b   : > { %6860 = vmatpush3.msra.mxu0 %v563_v9  ;;  %6870 = vmatprep.subr.mxu1 %v7666_v4 }
  0x2c   : > { %6861 = vmatprep.subr.mxu0 %v570_v10  ;;  %6871 = vmatpush3.msra.mxu1 %v7666_v4 }
  0x2d   : > { %6862 = vmatpush3.msra.mxu0 %v570_v10  ;;  %6872 = vmatprep.subr.mxu1 %v7668_v5 }
  0x2e   : > { %6863 = vmatprep.subr.mxu0 %v577_v11  ;;  %6873 = vmatpush3.msra.mxu1 %v7668_v5 }
  0x2f   : > { %6864 = vmatpush3.msra.mxu0 %v577_v11  ;;  %6865 = vmatprep.mubr.f32.mxu0 %v511_v28 }
  0x30   : > { %6874 = vmatprep.subr.mxu1 %v7673_v7  ;;  %6866 = vmatmul.mubr.f32.vlgmr.msra.gmra.mxu0 %v521_v30 }
  0x31   : > { %6875 = vmatpush3.msra.mxu1 %v7673_v7  ;;  %6876 = vmatprep.mubr.f32.mxu1 %v512_v31  ;;  %v7800_v31 = vand.u32 4294901760, %v1014_v29 }
  0x32   : > { %6879 = vmatprep.subr.mxu0 %v7685_v12  ;;  %6877 = vmatmul.mubr.f32.vlgmr.msra.gmra.mxu1 %v522_v33 }
  0x33   : > { %6880 = vmatpush3.msra.mxu0 %v7685_v12  ;;  %6890 = vmatprep.subr.mxu1 %v7664_v3  ;;  %v1017_v12 = vld [vmem:[%s8377_s6 + $0x18] sm:$0xff]  ;;  %v7803_v32 = vsub.f32 %v1014_v29, %v7800_v31 }
  0x34   : > { %6881 = vmatprep.subr.mxu0 %v7688_v13  ;;  %6891 = vmatpush3.msra.mxu1 %v7664_v3 }
  0x35   : > { %6882 = vmatpush3.msra.mxu0 %v7688_v13  ;;  %6892 = vmatprep.subr.mxu1 %v7666_v4  ;;  %v1016_v13 = vld [vmem:[%s8377_s6 + $0x10] sm:$0xff]  ;;  %v7808_v33 = vand.u32 4294901760, %v7803_v32 }
  0x36   : > { %6883 = vmatprep.subr.mxu0 %v7690_v14  ;;  %6893 = vmatpush3.msra.mxu1 %v7666_v4  ;;  %v7763_v16 = vand.u32 4294901760, %v1016_v13 }
  0x37   : > { %6884 = vmatpush3.msra.mxu0 %v7690_v14  ;;  %6894 = vmatprep.subr.mxu1 %v7668_v5  ;;  %v1015_v14 = vld [vmem:[%s8377_s6 + $0x8] sm:$0xff]  ;;  %v1169_v34 = vsub.f32 %v7803_v32, %v7808_v33 }
  0x38   : > { %6885 = vmatprep.subr.mxu0 %v7696_v15  ;;  %6895 = vmatpush3.msra.mxu1 %v7668_v5  ;;  %v7765_v17 = vand.u32 4294901760, %v1015_v14  ;;  %v7771_v19 = vsub.f32 %v1016_v13, %v7763_v16 }
  0x39   : > { %6886 = vmatpush3.msra.mxu0 %v7696_v15  ;;  %6887 = vmatprep.mubr.f32.mxu0 %v7704_v22  ;;  %v7761_v15 = vand.u32 4294901760, %v1017_v12  ;;  %v1170_v35 = vand.u32 4294901760, %v1169_v34 }
  0x3a   : > { %6896 = vmatprep.subr.mxu1 %v7673_v7  ;;  %6888 = vmatmul.mubr.f32.vlgmr.msra.gmra.mxu0 %v520_v27  ;;  %v7774_v20 = vsub.f32 %v1015_v14, %v7765_v17 }
  0x3b   : > { %6897 = vmatpush3.msra.mxu1 %v7673_v7  ;;  %6898 = vmatprep.mubr.f32.mxu1 %v7704_v22  ;;  %v7768_v18 = vsub.f32 %v1017_v12, %v7761_v15  ;;  %v7782_v22 = vand.u32 4294901760, %v7771_v19 }
  0x3c   : > { %6899 = vmatmul.mubr.f32.vlgmr.msra.gmra.mxu1 %v520_v27  ;;  %6901 = vmatprep.subr.mxu0 %v7761_v15  ;;  %v7785_v23 = vand.u32 4294901760, %v7774_v20 }
  0x3d   : > { %6902 = vmatpush3.msra.mxu0 %v7761_v15  ;;  %v7779_v21 = vand.u32 4294901760, %v7768_v18  ;;  %v1155_v25 = vsub.f32 %v7771_v19, %v7782_v22 }
  0x3e   : > { %6903 = vmatprep.subr.mxu0 %v7763_v16  ;;  %v1162_v26 = vsub.f32 %v7774_v20, %v7785_v23 }
  0x3f   : > { %6904 = vmatpush3.msra.mxu0 %v7763_v16  ;;  %v1148_v24 = vsub.f32 %v7768_v18, %v7779_v21  ;;  %v1156_v28 = vand.u32 4294901760, %v1155_v25 }
  0x40   : > { %6905 = vmatprep.subr.mxu0 %v7765_v17  ;;  %v1163_v30 = vand.u32 4294901760, %v1162_v26 }
  0x41   : > { %6906 = vmatpush3.msra.mxu0 %v7765_v17  ;;  %v1149_v27 = vand.u32 4294901760, %v1148_v24 }
  0x42   : > { %6907 = vmatprep.subr.mxu0 %v7800_v31 }
  0x43   : > { %6912 = vmatprep.subr.mxu1 %v1149_v27  ;;  %6908 = vmatpush3.msra.mxu0 %v7800_v31 }
  0x44   : > { %6913 = vmatpush3.msra.mxu1 %v1149_v27  ;;  %6923 = vmatprep.subr.mxu0 %v7768_v18 }
  0x45   : > { %6914 = vmatprep.subr.mxu1 %v1156_v28 }
  0x46   : > { %6915 = vmatpush3.msra.mxu1 %v1156_v28 }
  0x47   : > { %6916 = vmatprep.subr.mxu1 %v1163_v30 }
  0x48   : > { %6917 = vmatpush3.msra.mxu1 %v1163_v30 }
  0x49   : > { %6918 = vmatprep.subr.mxu1 %v1170_v35 }
  0x4a   : > { %6919 = vmatpush3.msra.mxu1 %v1170_v35 }
  0x4b   : > { %6934 = vmatprep.subr.mxu1 %v7761_v15 }
  0xe7   : > { %v6845_v38 = vpop.f32.mrf.mxu0 }
  0xe8   : > { %v527_v44 = vadd.f32 %v6845_v38, %v433_v39 }
  0xe9   : > { %v6856_v40 = vpop.f32.mrf.mxu1  ;;  %v516_v41 = vpop.f32.mrf.mxu0 }
  0xea   : > { %v517_v45 = vadd.f32 %v516_v41, %v432_v42  ;;  %v624_v49 = vadd.f32 %v6856_v40, %v527_v44 }
  0xeb   : > { %v617_v46 = vpop.f32.mrf.mxu1 }
  0xec   : > { %v618_v50 = vadd.f32 %v617_v46, %v517_v45  ;;  %v6523_v45 = vld [vmem:[%s8376_s5] ss:$0 sm:$0xff] }
  0xf0   : > { %v6867_v43 = vpop.f32.mrf.mxu0 }
  0xf1   : > { %v711_v51 = vadd.f32 %v6867_v43, %v624_v49  ;;  %v6522_v43 = vld [vmem:[%s8375_s4] ss:$0 sm:$0xff] }
  0xf2   : > { %v6878_v47 = vpop.f32.mrf.mxu1  ;;  %v703_v48 = vpop.f32.mrf.mxu0 }
  0xf3   : > { %v704_v52 = vadd.f32 %v703_v48, %v618_v50  ;;  %v796_v55 = vadd.f32 %v6878_v47, %v711_v51 }
  0xf4   : > { %v787_v53 = vpop.f32.mrf.mxu1 }
  0xf5   : > { %v788_v56 = vadd.f32 %v787_v53, %v704_v52 }
  0xfa   : > { %v6889_v54 = vpop.f32.mrf.mxu0 }
  0xfb   : > { %v885_v59 = vadd.f32 %v6889_v54, %v796_v55 }
  0xfc   : > { %v6900_v57 = vpop.f32.mrf.mxu1  ;;  %v878_v58 = vpop.f32.mrf.mxu0 }
  0xfd   : > { %v879_v60 = vadd.f32 %v878_v58, %v788_v56  ;;  %v966_v63 = vadd.f32 %v6900_v57, %v885_v59 }
  0xfe   : > { %v959_v61 = vpop.f32.mrf.mxu1 }
  0xff   : > { %v960_v62 = vadd.f32 %v959_v61, %v879_v60  ;;  %v974_v1 = vsel %vm434_vm0, %v966_v63, 0.0 }
 0x101   : > { %v971_v0 = vsel %vm434_vm0, %v960_v62, 0.0 }
 0x102   : > { %972 = vadd.xlane.f32.xlu0 %v971_v0 }
 0x106   : > { %975 = vadd.xlane.f32.xlu0 %v974_v1  ;;  %v6524_v1 = vld [vmem:[%s8378_s7] ss:$0 sm:$0xff] }
 0x18b   : > { %v973_v2 = vpop.xlane.xlu0 %972 }
 0x18c   : > { %v978_v3 = vmul.f32 0.03125, %v973_v2 }
 0x18e   : > { %v980_v4 = vsub.f32 %v960_v62, %v978_v3 }
 0x18f   : > { %v976_v5 = vpop.xlane.xlu0 %975 }
 0x190   : > { %v979_v6 = vmul.f32 0.03125, %v976_v5  ;;  %v982_v7 = vmul.f32 %v980_v4, %v980_v4 }
 0x192   : > { %v7746_v8 = vsub.f32 %v966_v63, %v979_v6  ;;  %v984_v9 = vsel %vm434_vm0, %v982_v7, 0.0 }
 0x193   : > { %985 = vadd.xlane.f32.xlu1 %v984_v9 }
 0x194   : > { %v983_v10 = vmul.f32 %v7746_v8, %v7746_v8 }
 0x196   : > { %v987_v11 = vsel %vm434_vm0, %v983_v10, 0.0 }
 0x197   : > { %988 = vadd.xlane.f32.xlu1 %v987_v11 }
 0x21c   : > { %v986_v36 = vpop.xlane.xlu1 %985 }
 0x21d   : > { %v990_v37 = vmul.f32 0.03125, %v986_v36 }
 0x21f   : > { %v992_v38 = vadd.f32 1e-05, %v990_v37 }
 0x220   : > { %v989_v39 = vpop.xlane.xlu1 %988 }
 0x221   : > { %7423 = vrsqrt.f32 %v992_v38  ;;  %v991_v40 = vmul.f32 0.03125, %v989_v39 }
 0x223   : > { %v993_v41 = vadd.f32 1e-05, %v991_v40 }
 0x225   : > { %7425 = vrsqrt.f32 %v993_v41 }
 0x22e   : > { %v7424_v42 = vpop.eup %7423 }
 0x22f   : > { %v996_v44 = vmul.f32 %v7424_v42, %v980_v4 }
 0x231   : > { %v1004_v46 = vmul.f32 %v6522_v43, %v996_v44 }
 0x232   : > { %v7426_v47 = vpop.eup %7425 }
 0x233   : > { %v7820_v48 = vadd.f32 %v6523_v45, %v1004_v46  ;;  %v997_v49 = vmul.f32 %v7426_v47, %v7746_v8 }
 0x235   : > { %v1026_v50 = vsel %vm434_vm0, %v7820_v48, 0  ;;  %v1005_v51 = vmul.f32 %v6522_v43, %v997_v49 }
 0x236   : > { %v1100_v52 = vand.u32 4294901760, %v1026_v50 }
 0x237   : > { %v7825_v53 = vadd.f32 %v6523_v45, %v1005_v51 }
 0x238   : > { %6920 = vmatprep.mubr.f32.mxu1 %v1100_v52  ;;  %v1101_v54 = vsub.f32 %v1026_v50, %v1100_v52 }
 0x239   : > { %v1029_v55 = vsel %vm434_vm0, %v7825_v53, 0 }
 0x23a   : > { %v1110_v56 = vand.u32 4294901760, %v1029_v55  ;;  %v1102_v57 = vand.u32 4294901760, %v1101_v54 }
 0x23c   : > { %v1111_v58 = vsub.f32 %v1029_v55, %v1110_v56  ;;  %6921 = vmatmul.mubr.f32.vlgmr.msra.gmra.mxu1 %v1110_v56  ;;  %v1103_v59 = vsub.f32 %v1101_v54, %v1102_v57 }
 0x23d   : > { %6935 = vmatpush3.msra.mxu1 %v7761_v15  ;;  %6942 = vmatprep.mubr.f32.mxu1 %v1102_v57  ;;  %v2082_v57 = vlaneseq }
 0x23e   : > { %6936 = vmatprep.subr.mxu1 %v7763_v16  ;;  %v1104_v60 = vand.u32 4294901760, %v1103_v59  ;;  %v1112_v61 = vand.u32 4294901760, %v1111_v58  ;;  %v1559_v59 = vld [vmem:[%s425_s16] sm:$0x1]  ;;  %s7534_s16 = smov 104  }
 0x23f   : > { %6937 = vmatpush3.msra.mxu1 %v7763_v16 }
 0x240   : > { %6938 = vmatprep.subr.mxu1 %v7765_v17  ;;  %6909 = vmatprep.mubr.f32.mxu0 %v1104_v60  ;;  %v1113_v62 = vsub.f32 %v1111_v58, %v1112_v61 }
 0x241   : > { %6939 = vmatpush3.msra.mxu1 %v7765_v17 }
 0x242   : > { %6940 = vmatprep.subr.mxu1 %v7800_v31  ;;  %v1114_v63 = vand.u32 4294901760, %v1113_v62 }
 0x243   : > { %6941 = vmatpush3.msra.mxu1 %v7800_v31 }
 0x244   : > { %6943 = vmatmul.mubr.f32.vlgmr.msra.gmra.mxu1 %v1112_v61  ;;  %6956 = vmatprep.subr.mxu1 %v7761_v15 }
 0x245   : > { %6910 = vmatmul.mubr.f32.vlgmr.msra.gmra.mxu0 %v1114_v63  ;;  %6957 = vmatpush3.msra.mxu1 %v7761_v15  ;;  %v1560_v63 = vsub.f32 1.0, %v1559_v59 }
 0x246   : > { %6924 = vmatpush3.msra.mxu0 %v7768_v18  ;;  %6964 = vmatprep.mubr.f32.mxu1 %v1100_v52 }
 0x247   : > { %6925 = vmatprep.subr.mxu0 %v7771_v19  ;;  %6931 = vmatprep.mubr.f32.mxu0 %v1101_v54 }
 0x248   : > { %6958 = vmatprep.subr.mxu1 %v7763_v16  ;;  %6926 = vmatpush3.msra.mxu0 %v7771_v19 }
 0x249   : > { %6959 = vmatpush3.msra.mxu1 %v7763_v16  ;;  %6927 = vmatprep.subr.mxu0 %v7774_v20 }
 0x24a   : > { %6960 = vmatprep.subr.mxu1 %v7765_v17  ;;  %6928 = vmatpush3.msra.mxu0 %v7774_v20 }
 0x24b   : > { %6961 = vmatpush3.msra.mxu1 %v7765_v17  ;;  %6929 = vmatprep.subr.mxu0 %v7803_v32 }
 0x24c   : > { %6962 = vmatprep.subr.mxu1 %v7800_v31  ;;  %6930 = vmatpush3.msra.mxu0 %v7803_v32 }
 0x24d   : > { %6963 = vmatpush3.msra.mxu1 %v7800_v31  ;;  %6932 = vmatmul.mubr.f32.vlgmr.msra.gmra.mxu0 %v1111_v58 }
 0x24e   : > { %6945 = vmatprep.subr.mxu0 %v7779_v21  ;;  %6965 = vmatmul.mubr.f32.vlgmr.msra.gmra.mxu1 %v1110_v56 }
 0x24f   : > { %6946 = vmatpush3.msra.mxu0 %v7779_v21  ;;  %6953 = vmatprep.mubr.f32.mxu0 %v1100_v52 }
 0x250   : > { %6947 = vmatprep.subr.mxu0 %v7782_v22 }
 0x251   : > { %6948 = vmatpush3.msra.mxu0 %v7782_v22 }
 0x252   : > { %6949 = vmatprep.subr.mxu0 %v7785_v23 }
 0x253   : > { %6950 = vmatpush3.msra.mxu0 %v7785_v23 }
 0x254   : > { %6951 = vmatprep.subr.mxu0 %v7808_v33 }
 0x255   : > { %6952 = vmatpush3.msra.mxu0 %v7808_v33 }
 0x256   : > { %6954 = vmatmul.mubr.f32.vlgmr.msra.gmra.mxu0 %v1110_v56 }
 0x2fc   : > { %v6922_v2 = vpop.f32.mrf.mxu1 }
 0x2fe   : > { %v1207_v7 = vpop.f32.mrf.mxu1 }
 0x304   : > { %v6944_v9 = vpop.f32.mrf.mxu1 }
 0x305   : > { %v6911_v0 = vpop.f32.mrf.mxu0 }
 0x306   : > { %v1117_v4 = vadd.f32 %v6911_v0, %v6524_v1  ;;  %v1377_v14 = vpop.f32.mrf.mxu1  ;;  %v2083_v0 = vshrl.u32 %v2082_v57, 7 }
 0x307   : > { %v1106_v3 = vpop.f32.mrf.mxu0 }
 0x308   : > { %v1107_v5 = vadd.f32 %v6524_v1, %v1106_v3  ;;  %v1214_v8 = vadd.f32 %v6922_v2, %v1117_v4 }
 0x30a   : > { %v1208_v12 = vadd.f32 %v1207_v7, %v1107_v5  ;;  %v1561_v7 = vmul.f32 -10000.0, %v1560_v63 }
 0x30d   : > { %v6933_v6 = vpop.f32.mrf.mxu0 }
 0x30e   : > { %v1301_v11 = vadd.f32 %v6933_v6, %v1214_v8  ;;  %v6966_v16 = vpop.f32.mrf.mxu1  ;;  %v2084_v8 = vsub.s32 0, %v2083_v0 }
 0x30f   : > { %v1293_v10 = vpop.f32.mrf.mxu0 }
 0x310   : > { %v1294_v13 = vadd.f32 %v1293_v10, %v1208_v12  ;;  %v1386_v15 = vadd.f32 %v6944_v9, %v1301_v11  ;;  %v1549_v23 = vpop.f32.mrf.mxu1 }
 0x312   : > { %v1378_v19 = vadd.f32 %v1377_v14, %v1294_v13  ;;  %v7878_v13 = vrot.slane %v1561_v7, %v2084_v8 }
 0x316   : > { %v6955_v17 = vpop.f32.mrf.mxu0 }
 0x317   : > { %v1475_v18 = vadd.f32 %v6955_v17, %v1386_v15 }
 0x318   : > { %v1468_v20 = vpop.f32.mrf.mxu0 }
 0x319   : > { %v7862_v21 = vadd.f32 %v6966_v16, %v1475_v18  ;;  %v1469_v22 = vadd.f32 %v1468_v20, %v1378_v19 }
 0x31b   : > { %v7864_v24 = vadd.f32 %v1549_v23, %v1469_v22  ;;  %1566 = vrot.lane.b32.xlu0 %v7862_v21, %s7525_s26  ;;  %v1571_v31 = vsel %vm1568_vm1, %v7862_v21, 0 }
 0x31c   : > { %v1654_v32 = vand.u32 4294901760, %v1571_v31 }
 0x31d   : > { %1564 = vrot.lane.b32.xlu1 %v7864_v24, %s7525_s26  ;;  %v1569_v25 = vsel %vm1568_vm1, %v7864_v24, 0  ;;  %s7531_s26 = smov 112  }
 0x31e   : > { %v1644_v26 = vand.u32 4294901760, %v1569_v25  ;;  %v1655_v33 = vsub.f32 %v1571_v31, %v1654_v32 }
 0x320   : > { %6978 = vmatprep.mubr.f32.mxu1 %v1644_v26  ;;  %v1645_v27 = vsub.f32 %v1569_v25, %v1644_v26  ;;  %v1656_v38 = vand.u32 4294901760, %v1655_v33 }
 0x322   : > { %v1646_v28 = vand.u32 4294901760, %v1645_v27  ;;  %v1657_v43 = vsub.f32 %v1655_v33, %v1656_v38 }
 0x324   : > { %v1647_v29 = vsub.f32 %v1645_v27, %v1646_v28  ;;  %v1658_v47 = vand.u32 4294901760, %v1657_v43 }
 0x326   : > { %v1648_v30 = vand.u32 4294901760, %v1647_v29 }
 0x328   : > { %6971 = vmatprep.mubr.f32.mxu0 %v1648_v30 }
 0x38d   : > { %v1567_v34 = vpop.permute.xlu0 %1566 }
 0x38e   : > { %v1575_v35 = vsel %vm1568_vm1, %v1567_v34, 0 }
 0x38f   : > { %v1606_v36 = vand.u32 4294901760, %v1575_v35  ;;  %v1565_v37 = vpop.permute.xlu1 %1564 }
 0x390   : > { %v1573_v39 = vsel %vm1568_vm1, %v1565_v37, 0 }
 0x391   : > { %v1694_v40 = vsub.f32 %v1575_v35, %v1606_v36  ;;  %v1609_v41 = vand.u32 4294901760, %v1573_v39  ;;  %6967 = vmatprep.subr.mxu0 %v1606_v36 }
 0x392   : > { %6968 = vmatpush3.xpose.msra.mxu0 %v1606_v36 }
 0x393   : > { %v1701_v42 = vsub.f32 %v1573_v39, %v1609_v41  ;;  %6969 = vmatprep.subr.mxu0 %v1609_v41  ;;  %v1695_v44 = vand.u32 4294901760, %v1694_v40 }
 0x395   : > { %v1696_v45 = vsub.f32 %v1694_v40, %v1695_v44  ;;  %v1702_v46 = vand.u32 4294901760, %v1701_v42 }
 0x396   : > { %6970 = vmatpush3.xpose.msra.mxu0 %v1609_v41 }
 0x397   : > { %6981 = vmatprep.subr.mxu0 %v1694_v40  ;;  %v1697_v49 = vand.u32 4294901760, %v1696_v45  ;;  %v1703_v50 = vsub.f32 %v1701_v42, %v1702_v46 }
 0x399   : > { %6972 = vmatmul.mubr.f32.vlgmr.msra.gmra.mxu0 %v1658_v47  ;;  %6974 = vmatprep.subr.mxu1 %v1697_v49  ;;  %v1704_v51 = vand.u32 4294901760, %v1703_v50 }
 0x39a   : > { %6975 = vmatpush3.xpose.msra.mxu1 %v1697_v49  ;;  %6982 = vmatpush3.xpose.msra.mxu0 %v1694_v40 }
 0x39b   : > { %6985 = vmatprep.mubr.f32.mxu0 %v1645_v27  ;;  %6976 = vmatprep.subr.mxu1 %v1704_v51 }
 0x39c   : > { %6983 = vmatprep.subr.mxu0 %v1701_v42 }
 0x39e   : > { %6977 = vmatpush3.xpose.msra.mxu1 %v1704_v51  ;;  %6984 = vmatpush3.xpose.msra.mxu0 %v1701_v42 }
 0x39f   : > { %6988 = vmatprep.subr.mxu1 %v1606_v36  ;;  %6995 = vmatprep.subr.mxu0 %v1695_v44 }
 0x3a1   : > { %6979 = vmatmul.mubr.f32.vlgmr.msra.gmra.mxu1 %v1654_v32  ;;  %6986 = vmatmul.mubr.f32.vlgmr.msra.gmra.mxu0 %v1655_v33 }
 0x3a2   : > { %6989 = vmatpush3.xpose.msra.mxu1 %v1606_v36  ;;  %6992 = vmatprep.mubr.f32.mxu1 %v1646_v28 }
 0x3a3   : > { %6996 = vmatpush3.xpose.msra.mxu0 %v1695_v44  ;;  %6999 = vmatprep.mubr.f32.mxu0 %v1644_v26 }
 0x3a4   : > { %6990 = vmatprep.subr.mxu1 %v1609_v41  ;;  %6997 = vmatprep.subr.mxu0 %v1702_v46 }
 0x3a6   : > { %6991 = vmatpush3.xpose.msra.mxu1 %v1609_v41 }
 0x3a7   : > { %6998 = vmatpush3.xpose.msra.mxu0 %v1702_v46  ;;  %7002 = vmatprep.subr.mxu1 %v1606_v36 }
 0x3a9   : > { %6993 = vmatmul.mubr.f32.vlgmr.msra.gmra.mxu1 %v1656_v38 }
 0x3aa   : > { %7000 = vmatmul.mubr.f32.vlgmr.msra.gmra.mxu0 %v1654_v32  ;;  %7003 = vmatpush3.xpose.msra.mxu1 %v1606_v36 }
 0x3ab   : > { %7006 = vmatprep.mubr.f32.mxu1 %v1644_v26  ;;  %7004 = vmatprep.subr.mxu1 %v1609_v41 }
 0x3ae   : > { %7005 = vmatpush3.xpose.msra.mxu1 %v1609_v41 }
 0x3b1   : > { %7007 = vmatmul.mubr.f32.vlgmr.msra.gmra.mxu1 %v1654_v32 }
 0x459   : > { %v6973_v52 = vpop.f32.mrf.mxu0 }
 0x45b   : > { %v1650_v55 = vpop.f32.mrf.mxu0 }
 0x461   : > { %v6980_v54 = vpop.f32.mrf.mxu1  ;;  %v6987_v60 = vpop.f32.mrf.mxu0 }
 0x462   : > { %v1748_v58 = vadd.f32 %v6980_v54, %v6973_v52 }
 0x463   : > { %v1741_v56 = vpop.f32.mrf.mxu1  ;;  %v1823_v2 = vpop.f32.mrf.mxu0 }
 0x464   : > { %v1742_v61 = vadd.f32 %v1741_v56, %v1650_v55  ;;  %v1831_v1 = vadd.f32 %v6987_v60, %v1748_v58 }
 0x466   : > { %v1824_v4 = vadd.f32 %v1823_v2, %v1742_v61 }
 0x469   : > { %v6994_v62 = vpop.f32.mrf.mxu1 }
 0x46a   : > { %v1914_v5 = vadd.f32 %v6994_v62, %v1831_v1  ;;  %v7001_v6 = vpop.f32.mrf.mxu0 }
 0x46b   : > { %v1905_v3 = vpop.f32.mrf.mxu1 }
 0x46c   : > { %v1906_v9 = vadd.f32 %v1905_v3, %v1824_v4  ;;  %v1997_v10 = vadd.f32 %v7001_v6, %v1914_v5  ;;  %v1990_v11 = vpop.f32.mrf.mxu0 }
 0x46e   : > { %v1991_v14 = vadd.f32 %v1990_v11, %v1906_v9 }
 0x471   : > { %v7008_v12 = vpop.f32.mrf.mxu1 }
 0x472   : > { %v2076_v15 = vadd.f32 %v7008_v12, %v1997_v10 }
 0x473   : > { %v2069_v16 = vpop.f32.mrf.mxu1 }
 0x474   : > { %v2080_v17 = vmul.f32 0.35355338, %v2076_v15  ;;  %v2070_v18 = vadd.f32 %v2069_v16, %v1991_v14 }
 0x476   : > { %v2079_v19 = vmul.f32 0.35355338, %v2070_v18  ;;  %v2088_v20 = vadd.f32 %v7878_v13, %v2080_v17 }
 0x478   : > { %v2093_v22 = vsel %vm2089_vm2, %v2088_v20, -inf  ;;  %v2087_v23 = vadd.f32 %v7878_v13, %v2079_v19 }
 0x479   : > { %2094 = vmax.xlane.f32.xlu0 %v2093_v22 }
 0x47a   : > { %v2090_v25 = vsel %vm2089_vm2, %v2087_v23, -inf }
 0x47b   : > { %2091 = vmax.xlane.f32.xlu1 %v2090_v25 }
 0x502   : > { %v2095_v26 = vpop.xlane.xlu0 %2094 }
 0x503   : > { %v2097_v27 = vsub.f32 %v2088_v20, %v2095_v26 }
 0x504   : > { %v2092_v28 = vpop.xlane.xlu1 %2091 }
 0x505   : > { %v2100_v29 = vmul.f32 1.442695, %v2097_v27  ;;  %v2096_v30 = vsub.f32 %v2087_v23, %v2092_v28 }
 0x507   : > { %7427 = vpow2.f32 %v2100_v29  ;;  %v2098_v31 = vmul.f32 1.442695, %v2096_v30 }
 0x509   : > { %7429 = vpow2.f32 %v2098_v31 }
 0x514   : > { %v7428_v32 = vpop.eup %7427 }
 0x515   : > { %v2105_v33 = vsel %vm2089_vm2, %v7428_v32, 0.0 }
 0x516   : > { %v7430_v34 = vpop.eup %7429  ;;  %2106 = vadd.xlane.f32.xlu1 %v2105_v33 }
 0x517   : > { %v2102_v35 = vsel %vm2089_vm2, %v7430_v34, 0.0 }
 0x518   : > { %2103 = vadd.xlane.f32.xlu0 %v2102_v35 }
 0x527   : > { %2112 = vrot.lane.b32.xlu1 %v7864_v24, %s7526_s29 }
 0x52b   : > { %2634 = vrot.lane.b32.xlu1 %v7862_v21, %s7527_s17 }
 0x52e   : > { %2114 = vrot.lane.b32.xlu0 %v7862_v21, %s7526_s29  ;;  %s7535_s29 = smov 40  }
 0x52f   : > { %2632 = vrot.lane.b32.xlu1 %v7864_v24, %s7527_s17  ;;  %s8384_s17 = smov 8  }
 0x532   : > { %2628 = vrot.lane.b32.xlu0 %v7864_v24, %s7528_s18 }
 0x533   : > { %2630 = vrot.lane.b32.xlu1 %v7862_v21, %s7528_s18  ;;  %s7537_s18 = smov 16  }
 0x59f   : > { %v2107_v36 = vpop.xlane.xlu1 %2106 }
 0x5a0   : > { %7431 = vrcp.f32 %v2107_v36 }
 0x5a1   : > { %v2104_v37 = vpop.xlane.xlu0 %2103 }
 0x5a2   : > { %7433 = vrcp.f32 %v2104_v37 }
 0x5a3   : > { %v2113_v38 = vpop.permute.xlu1 %2112 }
 0x5a4   : > { %v7892_v39 = vand.u32 4294901760, %v2113_v38 }
 0x5a5   : > { %v2115_v40 = vpop.permute.xlu0 %2114 }
 0x5a6   : > { %v7895_v41 = vsub.f32 %v2113_v38, %v7892_v39  ;;  %v2153_v42 = vand.u32 4294901760, %v2115_v40 }
 0x5a7   : > { %v2635_v43 = vpop.permute.xlu1 %2634 }
 0x5a8   : > { %v7897_v44 = vsub.f32 %v2115_v40, %v2153_v42  ;;  %7009 = vmatprep.subr.mxu0 %v2153_v42  ;;  %v7900_v45 = vand.u32 4294901760, %v7895_v41  ;;  %v2642_v46 = vsel %vm1568_vm1, %v2635_v43, 0 }
 0x5a9   : > { %7010 = vmatpush3.msra.mxu0 %v2153_v42  ;;  %v7908_v50 = vand.u32 4294901760, %v2642_v46  ;;  %v2629_v1 = vpop.permute.xlu0 %2628 }
 0x5aa   : > { %7011 = vmatprep.subr.mxu0 %v7892_v39  ;;  %v7905_v47 = vand.u32 4294901760, %v7897_v44  ;;  %v2250_v54 = vsub.f32 %v7895_v41, %v7900_v45  ;;  %v2636_v7 = vsel %vm1568_vm1, %v2629_v1, 0 }
 0x5ab   : > { %7012 = vmatpush3.msra.mxu0 %v7892_v39  ;;  %v2633_v49 = vpop.permute.xlu1 %2632  ;;  %v7919_v60 = vsub.f32 %v2642_v46, %v7908_v50  ;;  %v7937_v12 = vand.u32 4294901760, %v2636_v7 }
 0x5ac   : > { %v2640_v51 = vsel %vm1568_vm1, %v2633_v49, 0  ;;  %7023 = vmatprep.subr.mxu0 %v7897_v44  ;;  %v2243_v52 = vsub.f32 %v7897_v44, %v7905_v47  ;;  %v2251_v61 = vand.u32 4294901760, %v2250_v54 }
 0x5ad   : > { %v7432_v55 = vpop.eup %7431  ;;  %v7916_v59 = vand.u32 4294901760, %v2640_v51  ;;  %v7930_v6 = vand.u32 4294901760, %v7919_v60  ;;  %v2712_v22 = vsub.f32 %v2636_v7, %v7937_v12 }
 0x5ae   : > { %v2244_v56 = vand.u32 4294901760, %v2243_v52  ;;  %v2111_v57 = vmul.f32 %v7432_v55, %v7428_v32 }
 0x5af   : > { %v7434_v58 = vpop.eup %7433  ;;  %v7926_v3 = vsub.f32 %v2640_v51, %v7916_v59  ;;  %v2631_v14 = vpop.permute.xlu1 %2630  ;;  %v2763_v15 = vsub.f32 %v7919_v60, %v7930_v6  ;;  %v2713_v28 = vand.u32 4294901760, %v2712_v22 }
 0x5b0   : > { %7016 = vmatprep.subr.mxu1 %v2244_v56  ;;  %v2109_v62 = vmul.f32 %v7434_v58, %v7430_v34  ;;  %v2122_v63 = vsel %vm2089_vm2, %v2111_v57, 0  ;;  %v2638_v18 = vsel %vm1568_vm1, %v2631_v14, 0 }
 0x5b1   : > { %7017 = vmatpush3.msra.mxu1 %v2244_v56  ;;  %v7922_v0 = vand.u32 4294901760, %v2122_v63  ;;  %v7935_v11 = vand.u32 4294901760, %v7926_v3  ;;  %v2764_v23 = vand.u32 4294901760, %v2763_v15  ;;  %v2721_v26 = vand.u32 4294901760, %v2638_v18 }
 0x5b2   : > { %7018 = vmatprep.subr.mxu1 %v2251_v61  ;;  %v2119_v2 = vsel %vm2089_vm2, %v2109_v62, 0  ;;  %v2714_v30 = vsub.f32 %v2712_v22, %v2713_v28 }
 0x5b3   : > { %7019 = vmatpush3.msra.mxu1 %v2251_v61  ;;  %v2191_v4 = vand.u32 4294901760, %v2119_v2  ;;  %v2202_v5 = vsub.f32 %v2122_v63, %v7922_v0  ;;  %v2770_v20 = vsub.f32 %v7926_v3, %v7935_v11  ;;  %v2722_v29 = vsub.f32 %v2638_v18, %v2721_v26 }
 0x5b4   : > { %7030 = vmatprep.subr.mxu1 %v2153_v42  ;;  %v2715_v32 = vand.u32 4294901760, %v2714_v30 }
 0x5b5   : > { %7020 = vmatprep.mubr.f32.mxu1 %v2191_v4  ;;  %v2192_v8 = vsub.f32 %v2119_v2, %v2191_v4  ;;  %v2203_v9 = vand.u32 4294901760, %v2202_v5  ;;  %v2771_v27 = vand.u32 4294901760, %v2770_v20  ;;  %v2723_v31 = vand.u32 4294901760, %v2722_v29 }
 0x5b6   : > { %7021 = vmatmul.mubr.f32.vlgmr.msra.gmra.mxu1 %v7922_v0 }
 0x5b7   : > { %7031 = vmatpush3.msra.mxu1 %v2153_v42  ;;  %v2193_v10 = vand.u32 4294901760, %v2192_v8  ;;  %v2204_v16 = vsub.f32 %v2202_v5, %v2203_v9  ;;  %v2724_v33 = vsub.f32 %v2722_v29, %v2723_v31 }
 0x5b8   : > { %7032 = vmatprep.subr.mxu1 %v7892_v39 }
 0x5b9   : > { %7033 = vmatpush3.msra.mxu1 %v7892_v39  ;;  %7034 = vmatprep.mubr.f32.mxu1 %v2193_v10  ;;  %v2194_v17 = vsub.f32 %v2192_v8, %v2193_v10  ;;  %v2205_v25 = vand.u32 4294901760, %v2204_v16  ;;  %v2725_v34 = vand.u32 4294901760, %v2724_v33 }
 0x5ba   : > { %7044 = vmatprep.subr.mxu1 %v2153_v42  ;;  %7035 = vmatmul.mubr.f32.vlgmr.msra.gmra.mxu1 %v2203_v9 }
 0x5bb   : > { %7045 = vmatpush3.msra.mxu1 %v2153_v42  ;;  %7048 = vmatprep.mubr.f32.mxu1 %v2191_v4  ;;  %v2195_v19 = vand.u32 4294901760, %v2194_v17 }
 0x5bc   : > { %7046 = vmatprep.subr.mxu1 %v7892_v39 }
 0x5bd   : > { %7047 = vmatpush3.msra.mxu1 %v7892_v39  ;;  %7013 = vmatprep.mubr.f32.mxu0 %v2195_v19 }
 0x5be   : > { %7058 = vmatprep.subr.mxu1 %v2764_v23  ;;  %7014 = vmatmul.mubr.f32.vlgmr.msra.gmra.mxu0 %v2205_v25 }
 0x5bf   : > { %7024 = vmatpush3.msra.mxu0 %v7897_v44  ;;  %7049 = vmatmul.mubr.f32.vlgmr.msra.gmra.mxu1 %v7922_v0 }
 0x5c0   : > { %7059 = vmatpush3.xpose.msra.mxu1 %v2764_v23  ;;  %7025 = vmatprep.subr.mxu0 %v7895_v41 }
 0x5c1   : > { %7027 = vmatprep.mubr.f32.mxu0 %v2192_v8  ;;  %7060 = vmatprep.subr.mxu1 %v2771_v27 }
 0x5c2   : > { %7062 = vmatprep.mubr.f32.mxu1 %v7937_v12  ;;  %7026 = vmatpush3.msra.mxu0 %v7895_v41 }
 0x5c3   : > { %7037 = vmatprep.subr.mxu0 %v7905_v47  ;;  %7028 = vmatmul.mubr.f32.vlgmr.msra.gmra.mxu0 %v2202_v5 }
 0x5c4   : > { %7038 = vmatpush3.msra.mxu0 %v7905_v47  ;;  %7061 = vmatpush3.xpose.msra.mxu1 %v2771_v27 }
 0x5c5   : > { %7039 = vmatprep.subr.mxu0 %v7900_v45  ;;  %7041 = vmatprep.mubr.f32.mxu0 %v2191_v4 }
 0x5c6   : > { %7072 = vmatprep.subr.mxu1 %v7908_v50  ;;  %7040 = vmatpush3.msra.mxu0 %v7900_v45 }
 0x5c7   : > { %7051 = vmatprep.subr.mxu0 %v7908_v50  ;;  %7063 = vmatmul.mubr.f32.vlgmr.msra.gmra.mxu1 %v2721_v26 }
 0x5c8   : > { %7042 = vmatmul.mubr.f32.vlgmr.msra.gmra.mxu0 %v7922_v0  ;;  %7073 = vmatpush3.xpose.msra.mxu1 %v7908_v50 }
 0x5c9   : > { %7052 = vmatpush3.xpose.msra.mxu0 %v7908_v50  ;;  %7076 = vmatprep.mubr.f32.mxu1 %v2713_v28 }
 0x5ca   : > { %7053 = vmatprep.subr.mxu0 %v7916_v59  ;;  %7055 = vmatprep.mubr.f32.mxu0 %v2715_v32 }
 0x5cb   : > { %7074 = vmatprep.subr.mxu1 %v7916_v59 }
 0x5cc   : > { %7075 = vmatpush3.xpose.msra.mxu1 %v7916_v59 }
 0x5cd   : > { %7054 = vmatpush3.xpose.msra.mxu0 %v7916_v59  ;;  %7086 = vmatprep.subr.mxu1 %v7908_v50 }
 0x5ce   : > { %7065 = vmatprep.subr.mxu0 %v7919_v60 }
 0x5cf   : > { %7077 = vmatmul.mubr.f32.vlgmr.msra.gmra.mxu1 %v2723_v31 }
 0x5d0   : > { %7056 = vmatmul.mubr.f32.vlgmr.msra.gmra.mxu0 %v2725_v34  ;;  %7087 = vmatpush3.xpose.msra.mxu1 %v7908_v50 }
 0x5d1   : > { %7066 = vmatpush3.xpose.msra.mxu0 %v7919_v60  ;;  %7069 = vmatprep.mubr.f32.mxu0 %v2712_v22 }
 0x5d2   : > { %7090 = vmatprep.mubr.f32.mxu1 %v7937_v12  ;;  %7067 = vmatprep.subr.mxu0 %v7926_v3 }
 0x5d3   : > { %7088 = vmatprep.subr.mxu1 %v7916_v59 }
 0x5d4   : > { %7089 = vmatpush3.xpose.msra.mxu1 %v7916_v59 }
 0x5d5   : > { %7068 = vmatpush3.xpose.msra.mxu0 %v7926_v3 }
 0x5d6   : > { %7079 = vmatprep.subr.mxu0 %v7930_v6 }
 0x5d7   : > { %7091 = vmatmul.mubr.f32.vlgmr.msra.gmra.mxu1 %v2721_v26 }
 0x5d8   : > { %7070 = vmatmul.mubr.f32.vlgmr.msra.gmra.mxu0 %v2722_v29 }
 0x5d9   : > { %7080 = vmatpush3.xpose.msra.mxu0 %v7930_v6  ;;  %7083 = vmatprep.mubr.f32.mxu0 %v7937_v12 }
 0x5da   : > { %7081 = vmatprep.subr.mxu0 %v7935_v11 }
 0x5dd   : > { %7082 = vmatpush3.xpose.msra.mxu0 %v7935_v11 }
 0x5e0   : > { %7084 = vmatmul.mubr.f32.vlgmr.msra.gmra.mxu0 %v2721_v26 }
 0x676   : > { %v7022_v35 = vpop.f32.mrf.mxu1 }
 0x678   : > { %v2288_v36 = vpop.f32.mrf.mxu1 }
 0x67a   : > { %v7036_v38 = vpop.f32.mrf.mxu1 }
 0x67c   : > { %v2452_v42 = vpop.f32.mrf.mxu1 }
 0x67e   : > { %v7015_v37 = vpop.f32.mrf.mxu0 }
 0x67f   : > { %v2295_v40 = vadd.f32 %v7022_v35, %v7015_v37  ;;  %v7050_v49 = vpop.f32.mrf.mxu1 }
 0x680   : > { %v2197_v39 = vpop.f32.mrf.mxu0 }
 0x681   : > { %v2289_v43 = vadd.f32 %v2288_v36, %v2197_v39  ;;  %v2616_v57 = vpop.f32.mrf.mxu1 }
 0x683   : > { %v7029_v41 = vpop.f32.mrf.mxu0 }
 0x684   : > { %v2378_v44 = vadd.f32 %v7029_v41, %v2295_v40 }
 0x685   : > { %v2370_v45 = vpop.f32.mrf.mxu0 }
 0x686   : > { %v2371_v46 = vadd.f32 %v2370_v45, %v2289_v43  ;;  %v2461_v47 = vadd.f32 %v7036_v38, %v2378_v44 }
 0x687   : > { %v7064_v60 = vpop.f32.mrf.mxu1 }
 0x688   : > { %v7043_v50 = vpop.f32.mrf.mxu0  ;;  %v2453_v51 = vadd.f32 %v2452_v42, %v2371_v46 }
 0x689   : > { %v2544_v52 = vadd.f32 %v7043_v50, %v2461_v47  ;;  %v2808_v62 = vpop.f32.mrf.mxu1 }
 0x68a   : > { %v2537_v54 = vpop.f32.mrf.mxu0 }
 0x68b   : > { %v2623_v55 = vadd.f32 %v7050_v49, %v2544_v52  ;;  %v2538_v56 = vadd.f32 %v2537_v54, %v2453_v51 }
 0x68d   : > { %2627 = vst.msk [vmem:[#allocation2 + $0x8] sm:$0xff] %vm1568_vm1, %v2623_v55  ;;  %v2617_v58 = vadd.f32 %v2616_v57, %v2538_v56 }
 0x68f   : > { %2626 = vst.msk [vmem:[#allocation2] sm:$0xff] %vm1568_vm1, %v2617_v58  ;;  %v7078_v1 = vpop.f32.mrf.mxu1 }
 0x690   : > { %v7057_v59 = vpop.f32.mrf.mxu0 }
 0x691   : > { %v2815_v0 = vadd.f32 %v7064_v60, %v7057_v59  ;;  %v2972_v6 = vpop.f32.mrf.mxu1 }
 0x692   : > { %v2717_v61 = vpop.f32.mrf.mxu0 }
 0x693   : > { %v2809_v3 = vadd.f32 %v2808_v62, %v2717_v61 }
 0x697   : > { %v7092_v8 = vpop.f32.mrf.mxu1 }
 0x698   : > { %v7071_v63 = vpop.f32.mrf.mxu0 }
 0x699   : > { %v2898_v4 = vadd.f32 %v7071_v63, %v2815_v0  ;;  %v3136_v16 = vpop.f32.mrf.mxu1 }
 0x69a   : > { %v2890_v2 = vpop.f32.mrf.mxu0 }
 0x69b   : > { %v2891_v5 = vadd.f32 %v2890_v2, %v2809_v3  ;;  %v2981_v7 = vadd.f32 %v7078_v1, %v2898_v4 }
 0x69d   : > { %v2973_v11 = vadd.f32 %v2972_v6, %v2891_v5 }
 0x6a0   : > { %v7085_v9 = vpop.f32.mrf.mxu0 }
 0x6a1   : > { %v3064_v10 = vadd.f32 %v7085_v9, %v2981_v7 }
 0x6a2   : > { %v3057_v12 = vpop.f32.mrf.mxu0 }
 0x6a3   : > { %v3143_v14 = vadd.f32 %v7092_v8, %v3064_v10  ;;  %v3058_v15 = vadd.f32 %v3057_v12, %v2973_v11 }
 0x6a5   : > { %v3147_v17 = vmul.f32 0.35355338, %v3143_v14  ;;  %v3137_v18 = vadd.f32 %v3136_v16, %v3058_v15 }
 0x6a7   : > { %v3146_v19 = vmul.f32 0.35355338, %v3137_v18  ;;  %v3149_v20 = vadd.f32 %v3147_v17, %v7878_v13 }
 0x6a9   : > { %v3153_v22 = vsel %vm2089_vm2, %v3149_v20, -inf  ;;  %v3148_v23 = vadd.f32 %v3146_v19, %v7878_v13 }
 0x6aa   : > { %3154 = vmax.xlane.f32.xlu1 %v3153_v22 }
 0x6ab   : > { %v3150_v25 = vsel %vm2089_vm2, %v3148_v23, -inf }
 0x6ac   : > { %3151 = vmax.xlane.f32.xlu0 %v3150_v25 }
 0x6bb   : > { %3172 = vrot.lane.b32.xlu1 %v7864_v24, %s7529_s19 }
 0x6bf   : > { %3703 = vrot.lane.b32.xlu1 %v7862_v21, %s7530_s20 }
 0x6c3   : > { %3701 = vrot.lane.b32.xlu1 %v7864_v24, %s7530_s20  ;;  %s6534_s20 = sshll.u32 %s7627_s25, 8 }
 0x6c7   : > { %3699 = vrot.lane.b32.xlu1 %v7862_v21, %s7531_s26 }
 0x733   : > { %v3155_v26 = vpop.xlane.xlu1 %3154 }
 0x734   : > { %v3157_v27 = vsub.f32 %v3149_v20, %v3155_v26 }
 0x735   : > { %v3152_v28 = vpop.xlane.xlu0 %3151 }
 0x736   : > { %v3160_v29 = vmul.f32 1.442695, %v3157_v27  ;;  %v3156_v30 = vsub.f32 %v3148_v23, %v3152_v28 }
 0x737   : > { %v3173_v36 = vpop.permute.xlu1 %3172 }
 0x738   : > { %7435 = vpow2.f32 %v3160_v29  ;;  %v3158_v31 = vmul.f32 1.442695, %v3156_v30  ;;  %v7995_v38 = vand.u32 4294901760, %v3173_v36 }
 0x73a   : > { %7437 = vpow2.f32 %v3158_v31  ;;  %v7998_v41 = vsub.f32 %v3173_v36, %v7995_v38 }
 0x73b   : > { %v3704_v40 = vpop.permute.xlu1 %3703 }
 0x73c   : > { %v3711_v44 = vsel %vm1568_vm1, %v3704_v40, 0  ;;  %v8004_v46 = vand.u32 4294901760, %v7998_v41 }
 0x73d   : > { %v8010_v51 = vand.u32 4294901760, %v3711_v44 }
 0x73e   : > { %v3310_v55 = vsub.f32 %v7998_v41, %v8004_v46 }
 0x73f   : > { %v3702_v47 = vpop.permute.xlu1 %3701  ;;  %v8025_v62 = vsub.f32 %v3711_v44, %v8010_v51 }
 0x740   : > { %v3709_v52 = vsel %vm1568_vm1, %v3702_v47, 0  ;;  %v3311_v63 = vand.u32 4294901760, %v3310_v55 }
 0x741   : > { %v8020_v60 = vand.u32 4294901760, %v3709_v52  ;;  %v8033_v7 = vand.u32 4294901760, %v8025_v62 }
 0x743   : > { %v8030_v4 = vsub.f32 %v3709_v52, %v8020_v60  ;;  %v3700_v12 = vpop.permute.xlu1 %3699  ;;  %v3832_v15 = vsub.f32 %v8025_v62, %v8033_v7 }
 0x744   : > { %v3707_v18 = vsel %vm1568_vm1, %v3700_v12, 0 }
 0x745   : > { %v7436_v32 = vpop.eup %7435  ;;  %v8038_v11 = vand.u32 4294901760, %v8030_v4  ;;  %v3833_v23 = vand.u32 4294901760, %v3832_v15  ;;  %v3790_v26 = vand.u32 4294901760, %v3707_v18 }
 0x746   : > { %v3165_v33 = vsel %vm2089_vm2, %v7436_v32, 0.0 }
 0x747   : > { %v7438_v34 = vpop.eup %7437  ;;  %3166 = vadd.xlane.f32.xlu0 %v3165_v33  ;;  %v3839_v20 = vsub.f32 %v8030_v4, %v8038_v11  ;;  %v3791_v29 = vsub.f32 %v3707_v18, %v3790_v26 }
 0x748   : > { %v3162_v35 = vsel %vm2089_vm2, %v7438_v34, 0.0 }
 0x749   : > { %v3840_v27 = vand.u32 4294901760, %v3839_v20  ;;  %v3792_v31 = vand.u32 4294901760, %v3791_v29 }
 0x74b   : > { %3163 = vadd.xlane.f32.xlu0 %v3162_v35  ;;  %v3793_v33 = vsub.f32 %v3791_v29, %v3792_v31 }
 0x761   : > { %3174 = vrot.lane.b32.xlu0 %v7862_v21, %s7529_s19  ;;  %s7538_s19 = smov 24  }
 0x765   : > { %3697 = vrot.lane.b32.xlu0 %v7864_v24, %s7531_s26 }
 0x7d0   : > { %v3167_v37 = vpop.xlane.xlu0 %3166 }
 0x7d1   : > { %7439 = vrcp.f32 %v3167_v37 }
 0x7d4   : > { %v3164_v39 = vpop.xlane.xlu0 %3163 }
 0x7d5   : > { %7441 = vrcp.f32 %v3164_v39 }
 0x7d8   : > { %v3175_v42 = vpop.permute.xlu0 %3174 }
 0x7d9   : > { %v3213_v43 = vand.u32 4294901760, %v3175_v42 }
 0x7db   : > { %v8001_v45 = vsub.f32 %v3175_v42, %v3213_v43  ;;  %7093 = vmatprep.subr.mxu0 %v3213_v43 }
 0x7dc   : > { %7094 = vmatpush3.msra.mxu0 %v3213_v43  ;;  %v3698_v2 = vpop.permute.xlu0 %3697 }
 0x7dd   : > { %7095 = vmatprep.subr.mxu0 %v7995_v38  ;;  %v8008_v49 = vand.u32 4294901760, %v8001_v45  ;;  %v3705_v8 = vsel %vm1568_vm1, %v3698_v2, 0 }
 0x7de   : > { %v7440_v50 = vpop.eup %7439  ;;  %7096 = vmatpush3.msra.mxu0 %v7995_v38  ;;  %v8040_v14 = vand.u32 4294901760, %v3705_v8 }
 0x7df   : > { %7107 = vmatprep.subr.mxu0 %v8001_v45  ;;  %v3303_v54 = vsub.f32 %v8001_v45, %v8008_v49  ;;  %v3171_v56 = vmul.f32 %v7440_v50, %v7436_v32 }
 0x7e0   : > { %v3781_v22 = vsub.f32 %v3705_v8, %v8040_v14 }
 0x7e1   : > { %v3304_v57 = vand.u32 4294901760, %v3303_v54  ;;  %v3182_v58 = vsel %vm2089_vm2, %v3171_v56, 0 }
 0x7e2   : > { %v7442_v59 = vpop.eup %7441  ;;  %v8022_v61 = vand.u32 4294901760, %v3182_v58  ;;  %v3782_v28 = vand.u32 4294901760, %v3781_v22 }
 0x7e3   : > { %7100 = vmatprep.subr.mxu1 %v3304_v57  ;;  %v3169_v0 = vmul.f32 %v7442_v59, %v7438_v34  ;;  %v3794_v34 = vand.u32 4294901760, %v3793_v33 }
 0x7e4   : > { %7101 = vmatpush3.msra.mxu1 %v3304_v57  ;;  %v3262_v1 = vsub.f32 %v3182_v58, %v8022_v61  ;;  %v3783_v30 = vsub.f32 %v3781_v22, %v3782_v28 }
 0x7e5   : > { %7102 = vmatprep.subr.mxu1 %v3311_v63  ;;  %v3179_v3 = vsel %vm2089_vm2, %v3169_v0, 0 }
 0x7e6   : > { %7103 = vmatpush3.msra.mxu1 %v3311_v63  ;;  %v3251_v5 = vand.u32 4294901760, %v3179_v3  ;;  %v3263_v6 = vand.u32 4294901760, %v3262_v1  ;;  %v3784_v32 = vand.u32 4294901760, %v3783_v30 }
 0x7e7   : > { %7114 = vmatprep.subr.mxu1 %v3213_v43 }
 0x7e8   : > { %7104 = vmatprep.mubr.f32.mxu1 %v3251_v5  ;;  %v3252_v9 = vsub.f32 %v3179_v3, %v3251_v5  ;;  %v3264_v16 = vsub.f32 %v3262_v1, %v3263_v6 }
 0x7e9   : > { %7105 = vmatmul.mubr.f32.vlgmr.msra.gmra.mxu1 %v8022_v61 }
 0x7ea   : > { %7115 = vmatpush3.msra.mxu1 %v3213_v43  ;;  %v3253_v10 = vand.u32 4294901760, %v3252_v9  ;;  %v3265_v25 = vand.u32 4294901760, %v3264_v16 }
 0x7eb   : > { %7116 = vmatprep.subr.mxu1 %v7995_v38 }
 0x7ec   : > { %7117 = vmatpush3.msra.mxu1 %v7995_v38  ;;  %7118 = vmatprep.mubr.f32.mxu1 %v3253_v10  ;;  %v3254_v17 = vsub.f32 %v3252_v9, %v3253_v10 }
 0x7ed   : > { %7128 = vmatprep.subr.mxu1 %v3213_v43  ;;  %7119 = vmatmul.mubr.f32.vlgmr.msra.gmra.mxu1 %v3263_v6 }
 0x7ee   : > { %7129 = vmatpush3.msra.mxu1 %v3213_v43  ;;  %7132 = vmatprep.mubr.f32.mxu1 %v3251_v5  ;;  %v3255_v19 = vand.u32 4294901760, %v3254_v17 }
 0x7ef   : > { %7130 = vmatprep.subr.mxu1 %v7995_v38 }
 0x7f0   : > { %7131 = vmatpush3.msra.mxu1 %v7995_v38  ;;  %7097 = vmatprep.mubr.f32.mxu0 %v3255_v19 }
 0x7f1   : > { %7142 = vmatprep.subr.mxu1 %v3833_v23  ;;  %7098 = vmatmul.mubr.f32.vlgmr.msra.gmra.mxu0 %v3265_v25 }
 0x7f2   : > { %7108 = vmatpush3.msra.mxu0 %v8001_v45  ;;  %7133 = vmatmul.mubr.f32.vlgmr.msra.gmra.mxu1 %v8022_v61 }
 0x7f3   : > { %7143 = vmatpush3.xpose.msra.mxu1 %v3833_v23  ;;  %7109 = vmatprep.subr.mxu0 %v7998_v41 }
 0x7f4   : > { %7111 = vmatprep.mubr.f32.mxu0 %v3252_v9  ;;  %7144 = vmatprep.subr.mxu1 %v3840_v27 }
 0x7f5   : > { %7146 = vmatprep.mubr.f32.mxu1 %v8040_v14  ;;  %7110 = vmatpush3.msra.mxu0 %v7998_v41 }
 0x7f6   : > { %7121 = vmatprep.subr.mxu0 %v8008_v49  ;;  %7112 = vmatmul.mubr.f32.vlgmr.msra.gmra.mxu0 %v3262_v1 }
 0x7f7   : > { %7122 = vmatpush3.msra.mxu0 %v8008_v49  ;;  %7145 = vmatpush3.xpose.msra.mxu1 %v3840_v27 }
 0x7f8   : > { %7123 = vmatprep.subr.mxu0 %v8004_v46  ;;  %7125 = vmatprep.mubr.f32.mxu0 %v3251_v5 }
 0x7f9   : > { %7156 = vmatprep.subr.mxu1 %v8010_v51  ;;  %7124 = vmatpush3.msra.mxu0 %v8004_v46 }
 0x7fa   : > { %7135 = vmatprep.subr.mxu0 %v8010_v51  ;;  %7147 = vmatmul.mubr.f32.vlgmr.msra.gmra.mxu1 %v3790_v26 }
 0x7fb   : > { %7126 = vmatmul.mubr.f32.vlgmr.msra.gmra.mxu0 %v8022_v61  ;;  %7157 = vmatpush3.xpose.msra.mxu1 %v8010_v51 }
 0x7fc   : > { %7136 = vmatpush3.xpose.msra.mxu0 %v8010_v51  ;;  %7160 = vmatprep.mubr.f32.mxu1 %v3782_v28 }
 0x7fd   : > { %7137 = vmatprep.subr.mxu0 %v8020_v60  ;;  %7139 = vmatprep.mubr.f32.mxu0 %v3784_v32 }
 0x7fe   : > { %7158 = vmatprep.subr.mxu1 %v8020_v60 }
 0x7ff   : > { %7159 = vmatpush3.xpose.msra.mxu1 %v8020_v60 }
 0x800   : > { %7138 = vmatpush3.xpose.msra.mxu0 %v8020_v60  ;;  %7170 = vmatprep.subr.mxu1 %v8010_v51 }
 0x801   : > { %7149 = vmatprep.subr.mxu0 %v8025_v62 }
 0x802   : > { %7161 = vmatmul.mubr.f32.vlgmr.msra.gmra.mxu1 %v3792_v31 }
 0x803   : > { %7140 = vmatmul.mubr.f32.vlgmr.msra.gmra.mxu0 %v3794_v34  ;;  %7171 = vmatpush3.xpose.msra.mxu1 %v8010_v51 }
 0x804   : > { %7150 = vmatpush3.xpose.msra.mxu0 %v8025_v62  ;;  %7153 = vmatprep.mubr.f32.mxu0 %v3781_v22 }
 0x805   : > { %7174 = vmatprep.mubr.f32.mxu1 %v8040_v14  ;;  %7151 = vmatprep.subr.mxu0 %v8030_v4 }
 0x806   : > { %7172 = vmatprep.subr.mxu1 %v8020_v60 }
 0x807   : > { %7173 = vmatpush3.xpose.msra.mxu1 %v8020_v60 }
 0x808   : > { %7152 = vmatpush3.xpose.msra.mxu0 %v8030_v4 }
 0x809   : > { %7163 = vmatprep.subr.mxu0 %v8033_v7 }
 0x80a   : > { %7175 = vmatmul.mubr.f32.vlgmr.msra.gmra.mxu1 %v3790_v26 }
 0x80b   : > { %7154 = vmatmul.mubr.f32.vlgmr.msra.gmra.mxu0 %v3791_v29 }
 0x80c   : > { %7164 = vmatpush3.xpose.msra.mxu0 %v8033_v7  ;;  %7167 = vmatprep.mubr.f32.mxu0 %v8040_v14 }
 0x80d   : > { %7165 = vmatprep.subr.mxu0 %v8038_v11 }
 0x810   : > { %7166 = vmatpush3.xpose.msra.mxu0 %v8038_v11 }
 0x813   : > { %7168 = vmatmul.mubr.f32.vlgmr.msra.gmra.mxu0 %v3790_v26 }
 0x8a9   : > { %v7106_v35 = vpop.f32.mrf.mxu1 }
 0x8ab   : > { %v3348_v36 = vpop.f32.mrf.mxu1 }
 0x8ad   : > { %v7120_v39 = vpop.f32.mrf.mxu1 }
 0x8af   : > { %v3512_v43 = vpop.f32.mrf.mxu1 }
 0x8b1   : > { %v7099_v37 = vpop.f32.mrf.mxu0 }
 0x8b2   : > { %v3355_v38 = vadd.f32 %v7106_v35, %v7099_v37  ;;  %v7134_v49 = vpop.f32.mrf.mxu1 }
 0x8b3   : > { %v3257_v40 = vpop.f32.mrf.mxu0 }
 0x8b4   : > { %v3349_v41 = vadd.f32 %v3348_v36, %v3257_v40  ;;  %v3676_v57 = vpop.f32.mrf.mxu1 }
 0x8b6   : > { %v7113_v42 = vpop.f32.mrf.mxu0 }
 0x8b7   : > { %v3438_v44 = vadd.f32 %v7113_v42, %v3355_v38 }
 0x8b8   : > { %v3430_v45 = vpop.f32.mrf.mxu0 }
 0x8b9   : > { %v3431_v46 = vadd.f32 %v3430_v45, %v3349_v41  ;;  %v3521_v47 = vadd.f32 %v7120_v39, %v3438_v44 }
 0x8ba   : > { %v7148_v60 = vpop.f32.mrf.mxu1 }
 0x8bb   : > { %v7127_v50 = vpop.f32.mrf.mxu0  ;;  %v3513_v51 = vadd.f32 %v3512_v43, %v3431_v46 }
 0x8bc   : > { %v3604_v52 = vadd.f32 %v7127_v50, %v3521_v47  ;;  %v3877_v62 = vpop.f32.mrf.mxu1 }
 0x8bd   : > { %v3597_v54 = vpop.f32.mrf.mxu0 }
 0x8be   : > { %v8084_v55 = vadd.f32 %v7134_v49, %v3604_v52  ;;  %v3598_v56 = vadd.f32 %v3597_v54, %v3513_v51 }
 0x8c0   : > { %v8086_v58 = vadd.f32 %v3676_v57, %v3598_v56 }
 0x8c2   : > { %v7162_v1 = vpop.f32.mrf.mxu1 }
 0x8c3   : > { %v7141_v59 = vpop.f32.mrf.mxu0 }
 0x8c4   : > { %v3884_v0 = vadd.f32 %v7148_v60, %v7141_v59  ;;  %v4041_v6 = vpop.f32.mrf.mxu1 }
 0x8c5   : > { %v3786_v61 = vpop.f32.mrf.mxu0 }
 0x8c6   : > { %v3878_v3 = vadd.f32 %v3877_v62, %v3786_v61 }
 0x8ca   : > { %v7176_v8 = vpop.f32.mrf.mxu1 }
 0x8cb   : > { %v7155_v63 = vpop.f32.mrf.mxu0 }
 0x8cc   : > { %v3967_v4 = vadd.f32 %v7155_v63, %v3884_v0  ;;  %v4205_v16 = vpop.f32.mrf.mxu1 }
 0x8cd   : > { %v3959_v2 = vpop.f32.mrf.mxu0 }
 0x8ce   : > { %v3960_v5 = vadd.f32 %v3959_v2, %v3878_v3  ;;  %v4050_v7 = vadd.f32 %v7162_v1, %v3967_v4 }
 0x8d0   : > { %v4042_v11 = vadd.f32 %v4041_v6, %v3960_v5 }
 0x8d3   : > { %v7169_v9 = vpop.f32.mrf.mxu0 }
 0x8d4   : > { %v4133_v10 = vadd.f32 %v7169_v9, %v4050_v7 }
 0x8d5   : > { %v4126_v12 = vpop.f32.mrf.mxu0 }
 0x8d6   : > { %v4212_v14 = vadd.f32 %v7176_v8, %v4133_v10  ;;  %v4127_v15 = vadd.f32 %v4126_v12, %v4042_v11 }
 0x8d8   : > { %v4216_v17 = vmul.f32 0.35355338, %v4212_v14  ;;  %v4206_v18 = vadd.f32 %v4205_v16, %v4127_v15 }
 0x8da   : > { %v4215_v19 = vmul.f32 0.35355338, %v4206_v18  ;;  %v4218_v20 = vadd.f32 %v4216_v17, %v7878_v13 }
 0x8dc   : > { %v4222_v22 = vsel %vm2089_vm2, %v4218_v20, -inf  ;;  %v4217_v23 = vadd.f32 %v4215_v19, %v7878_v13 }
 0x8dd   : > { %4223 = vmax.xlane.f32.xlu1 %v4222_v22 }
 0x8de   : > { %v4219_v25 = vsel %vm2089_vm2, %v4217_v23, -inf }
 0x8df   : > { %4220 = vmax.xlane.f32.xlu0 %v4219_v25 }
 0x8ee   : > { %4241 = vrot.lane.b32.xlu1 %v7864_v24, %s7532_s28 }
 0x8f2   : > { %4772 = vrot.lane.b32.xlu1 %v7862_v21, %s7533_s15 }
 0x8f6   : > { %4770 = vrot.lane.b32.xlu1 %v7864_v24, %s7533_s15 }
 0x8fa   : > { %4768 = vrot.lane.b32.xlu1 %v7862_v21, %s7534_s16 }
 0x966   : > { %v4224_v26 = vpop.xlane.xlu1 %4223 }
 0x967   : > { %v4226_v27 = vsub.f32 %v4218_v20, %v4224_v26 }
 0x968   : > { %v4221_v28 = vpop.xlane.xlu0 %4220 }
 0x969   : > { %v4229_v29 = vmul.f32 1.442695, %v4226_v27  ;;  %v4225_v30 = vsub.f32 %v4217_v23, %v4221_v28 }
 0x96a   : > { %v4242_v36 = vpop.permute.xlu1 %4241 }
 0x96b   : > { %7443 = vpow2.f32 %v4229_v29  ;;  %v4227_v31 = vmul.f32 1.442695, %v4225_v30  ;;  %v8100_v38 = vand.u32 4294901760, %v4242_v36 }
 0x96d   : > { %7445 = vpow2.f32 %v4227_v31  ;;  %v8103_v41 = vsub.f32 %v4242_v36, %v8100_v38 }
 0x96e   : > { %v4773_v40 = vpop.permute.xlu1 %4772 }
 0x96f   : > { %v4780_v44 = vsel %vm1568_vm1, %v4773_v40, 0  ;;  %v8109_v46 = vand.u32 4294901760, %v8103_v41 }
 0x970   : > { %v8115_v51 = vand.u32 4294901760, %v4780_v44 }
 0x971   : > { %v4379_v56 = vsub.f32 %v8103_v41, %v8109_v46 }
 0x972   : > { %v4771_v47 = vpop.permute.xlu1 %4770  ;;  %v8130_v0 = vsub.f32 %v4780_v44, %v8115_v51 }
 0x973   : > { %v4778_v52 = vsel %vm1568_vm1, %v4771_v47, 0  ;;  %v4380_v1 = vand.u32 4294901760, %v4379_v56 }
 0x974   : > { %v8125_v62 = vand.u32 4294901760, %v4778_v52  ;;  %v8138_v9 = vand.u32 4294901760, %v8130_v0 }
 0x976   : > { %v8135_v6 = vsub.f32 %v4778_v52, %v8125_v62  ;;  %v4769_v15 = vpop.permute.xlu1 %4768  ;;  %v4901_v17 = vsub.f32 %v8130_v0, %v8138_v9 }
 0x977   : > { %v4776_v20 = vsel %vm1568_vm1, %v4769_v15, 0 }
 0x978   : > { %v7444_v32 = vpop.eup %7443  ;;  %v8143_v14 = vand.u32 4294901760, %v8135_v6  ;;  %v4902_v26 = vand.u32 4294901760, %v4901_v17  ;;  %v4859_v28 = vand.u32 4294901760, %v4776_v20 }
 0x979   : > { %v4234_v33 = vsel %vm2089_vm2, %v7444_v32, 0.0 }
 0x97a   : > { %v7446_v34 = vpop.eup %7445  ;;  %4235 = vadd.xlane.f32.xlu0 %v4234_v33  ;;  %v4908_v23 = vsub.f32 %v8135_v6, %v8143_v14  ;;  %v4860_v31 = vsub.f32 %v4776_v20, %v4859_v28 }
 0x97b   : > { %v4231_v35 = vsel %vm2089_vm2, %v7446_v34, 0.0 }
 0x97c   : > { %v4909_v29 = vand.u32 4294901760, %v4908_v23  ;;  %v4861_v33 = vand.u32 4294901760, %v4860_v31 }
 0x97e   : > { %4232 = vadd.xlane.f32.xlu0 %v4231_v35  ;;  %v4862_v35 = vsub.f32 %v4860_v31, %v4861_v33 }
 0x980   : > { %v4863_v36 = vand.u32 4294901760, %v4862_v35 }
 0x994   : > { %4243 = vrot.lane.b32.xlu0 %v7862_v21, %s7532_s28  ;;  %s415_s28 = sand.u32 1, %s7515_s22  }
 0x998   : > { %4766 = vrot.lane.b32.xlu0 %v7864_v24, %s7534_s16  ;;  %s8325_s16 = scalar_lea.hbm %s8383_s12, %s6534_s20 }
 0xa03   : > { %v4236_v37 = vpop.xlane.xlu0 %4235 }
 0xa04   : > { %7447 = vrcp.f32 %v4236_v37 }
 0xa07   : > { %v4233_v39 = vpop.xlane.xlu0 %4232 }
 0xa08   : > { %7449 = vrcp.f32 %v4233_v39 }
 0xa0b   : > { %v4244_v42 = vpop.permute.xlu0 %4243 }
 0xa0c   : > { %v4282_v43 = vand.u32 4294901760, %v4244_v42 }
 0xa0e   : > { %v8106_v45 = vsub.f32 %v4244_v42, %v4282_v43  ;;  %7177 = vmatprep.subr.mxu0 %v4282_v43 }
 0xa0f   : > { %7178 = vmatpush3.msra.mxu0 %v4282_v43  ;;  %v4767_v4 = vpop.permute.xlu0 %4766 }
 0xa10   : > { %7179 = vmatprep.subr.mxu0 %v8100_v38  ;;  %v8113_v49 = vand.u32 4294901760, %v8106_v45  ;;  %v4774_v10 = vsel %vm1568_vm1, %v4767_v4, 0 }
 0xa11   : > { %v7448_v50 = vpop.eup %7447  ;;  %7180 = vmatpush3.msra.mxu0 %v8100_v38  ;;  %v8145_v16 = vand.u32 4294901760, %v4774_v10 }
 0xa12   : > { %7191 = vmatprep.subr.mxu0 %v8106_v45  ;;  %v4372_v54 = vsub.f32 %v8106_v45, %v8113_v49  ;;  %v4240_v57 = vmul.f32 %v7448_v50, %v7444_v32 }
 0xa13   : > { %v4850_v25 = vsub.f32 %v4774_v10, %v8145_v16 }
 0xa14   : > { %v4373_v59 = vand.u32 4294901760, %v4372_v54  ;;  %v4251_v60 = vsel %vm2089_vm2, %v4240_v57, 0 }
 0xa15   : > { %v7450_v61 = vpop.eup %7449  ;;  %v8127_v63 = vand.u32 4294901760, %v4251_v60  ;;  %v4851_v30 = vand.u32 4294901760, %v4850_v25 }
 0xa16   : > { %7184 = vmatprep.subr.mxu1 %v4373_v59  ;;  %v4238_v2 = vmul.f32 %v7450_v61, %v7446_v34 }
 0xa17   : > { %7185 = vmatpush3.msra.mxu1 %v4373_v59  ;;  %v4331_v3 = vsub.f32 %v4251_v60, %v8127_v63  ;;  %v4852_v32 = vsub.f32 %v4850_v25, %v4851_v30 }
 0xa18   : > { %7186 = vmatprep.subr.mxu1 %v4380_v1  ;;  %v4248_v5 = vsel %vm2089_vm2, %v4238_v2, 0 }
 0xa19   : > { %7187 = vmatpush3.msra.mxu1 %v4380_v1  ;;  %v4320_v7 = vand.u32 4294901760, %v4248_v5  ;;  %v4332_v8 = vand.u32 4294901760, %v4331_v3  ;;  %v4853_v34 = vand.u32 4294901760, %v4852_v32 }
 0xa1a   : > { %7198 = vmatprep.subr.mxu1 %v4282_v43 }
 0xa1b   : > { %7188 = vmatprep.mubr.f32.mxu1 %v4320_v7  ;;  %v4321_v11 = vsub.f32 %v4248_v5, %v4320_v7  ;;  %v4333_v18 = vsub.f32 %v4331_v3, %v4332_v8 }
 0xa1c   : > { %7189 = vmatmul.mubr.f32.vlgmr.msra.gmra.mxu1 %v8127_v63 }
 0xa1d   : > { %7199 = vmatpush3.msra.mxu1 %v4282_v43  ;;  %v4322_v12 = vand.u32 4294901760, %v4321_v11  ;;  %v4334_v27 = vand.u32 4294901760, %v4333_v18 }
 0xa1e   : > { %7200 = vmatprep.subr.mxu1 %v8100_v38 }
 0xa1f   : > { %7201 = vmatpush3.msra.mxu1 %v8100_v38  ;;  %7202 = vmatprep.mubr.f32.mxu1 %v4322_v12  ;;  %v4323_v19 = vsub.f32 %v4321_v11, %v4322_v12 }
 0xa20   : > { %7212 = vmatprep.subr.mxu1 %v4282_v43  ;;  %7203 = vmatmul.mubr.f32.vlgmr.msra.gmra.mxu1 %v4332_v8 }
 0xa21   : > { %7213 = vmatpush3.msra.mxu1 %v4282_v43  ;;  %7216 = vmatprep.mubr.f32.mxu1 %v4320_v7  ;;  %v4324_v22 = vand.u32 4294901760, %v4323_v19 }
 0xa22   : > { %7214 = vmatprep.subr.mxu1 %v8100_v38 }
 0xa23   : > { %7215 = vmatpush3.msra.mxu1 %v8100_v38  ;;  %7181 = vmatprep.mubr.f32.mxu0 %v4324_v22 }
 0xa24   : > { %7226 = vmatprep.subr.mxu1 %v4902_v26  ;;  %7182 = vmatmul.mubr.f32.vlgmr.msra.gmra.mxu0 %v4334_v27 }
 0xa25   : > { %7192 = vmatpush3.msra.mxu0 %v8106_v45  ;;  %7217 = vmatmul.mubr.f32.vlgmr.msra.gmra.mxu1 %v8127_v63 }
 0xa26   : > { %7227 = vmatpush3.xpose.msra.mxu1 %v4902_v26  ;;  %7193 = vmatprep.subr.mxu0 %v8103_v41 }
 0xa27   : > { %7195 = vmatprep.mubr.f32.mxu0 %v4321_v11  ;;  %7228 = vmatprep.subr.mxu1 %v4909_v29 }
 0xa28   : > { %7230 = vmatprep.mubr.f32.mxu1 %v8145_v16  ;;  %7194 = vmatpush3.msra.mxu0 %v8103_v41 }
 0xa29   : > { %7205 = vmatprep.subr.mxu0 %v8113_v49  ;;  %7196 = vmatmul.mubr.f32.vlgmr.msra.gmra.mxu0 %v4331_v3 }
 0xa2a   : > { %7206 = vmatpush3.msra.mxu0 %v8113_v49  ;;  %7229 = vmatpush3.xpose.msra.mxu1 %v4909_v29 }
 0xa2b   : > { %7207 = vmatprep.subr.mxu0 %v8109_v46  ;;  %7209 = vmatprep.mubr.f32.mxu0 %v4320_v7 }
 0xa2c   : > { %7240 = vmatprep.subr.mxu1 %v8115_v51  ;;  %7208 = vmatpush3.msra.mxu0 %v8109_v46 }
 0xa2d   : > { %7219 = vmatprep.subr.mxu0 %v8115_v51  ;;  %7231 = vmatmul.mubr.f32.vlgmr.msra.gmra.mxu1 %v4859_v28 }
 0xa2e   : > { %7210 = vmatmul.mubr.f32.vlgmr.msra.gmra.mxu0 %v8127_v63  ;;  %7241 = vmatpush3.xpose.msra.mxu1 %v8115_v51 }
 0xa2f   : > { %7220 = vmatpush3.xpose.msra.mxu0 %v8115_v51  ;;  %7244 = vmatprep.mubr.f32.mxu1 %v4851_v30 }
 0xa30   : > { %7221 = vmatprep.subr.mxu0 %v8125_v62  ;;  %7223 = vmatprep.mubr.f32.mxu0 %v4853_v34 }
 0xa31   : > { %7242 = vmatprep.subr.mxu1 %v8125_v62 }
 0xa32   : > { %7243 = vmatpush3.xpose.msra.mxu1 %v8125_v62 }
 0xa33   : > { %7222 = vmatpush3.xpose.msra.mxu0 %v8125_v62  ;;  %7254 = vmatprep.subr.mxu1 %v8115_v51 }
 0xa34   : > { %7233 = vmatprep.subr.mxu0 %v8130_v0 }
 0xa35   : > { %7245 = vmatmul.mubr.f32.vlgmr.msra.gmra.mxu1 %v4861_v33 }
 0xa36   : > { %7224 = vmatmul.mubr.f32.vlgmr.msra.gmra.mxu0 %v4863_v36  ;;  %7255 = vmatpush3.xpose.msra.mxu1 %v8115_v51 }
 0xa37   : > { %7234 = vmatpush3.xpose.msra.mxu0 %v8130_v0  ;;  %7237 = vmatprep.mubr.f32.mxu0 %v4850_v25 }
 0xa38   : > { %7258 = vmatprep.mubr.f32.mxu1 %v8145_v16  ;;  %7235 = vmatprep.subr.mxu0 %v8135_v6 }
 0xa39   : > { %7256 = vmatprep.subr.mxu1 %v8125_v62 }
 0xa3a   : > { %7257 = vmatpush3.xpose.msra.mxu1 %v8125_v62 }
 0xa3b   : > { %7236 = vmatpush3.xpose.msra.mxu0 %v8135_v6 }
 0xa3c   : > { %7247 = vmatprep.subr.mxu0 %v8138_v9 }
 0xa3d   : > { %7259 = vmatmul.mubr.f32.vlgmr.msra.gmra.mxu1 %v4859_v28 }
 0xa3e   : > { %7238 = vmatmul.mubr.f32.vlgmr.msra.gmra.mxu0 %v4860_v31 }
 0xa3f   : > { %7248 = vmatpush3.xpose.msra.mxu0 %v8138_v9  ;;  %7251 = vmatprep.mubr.f32.mxu0 %v8145_v16 }
 0xa40   : > { %7249 = vmatprep.subr.mxu0 %v8143_v14 }
 0xa43   : > { %7250 = vmatpush3.xpose.msra.mxu0 %v8143_v14 }
 0xa46   : > { %7252 = vmatmul.mubr.f32.vlgmr.msra.gmra.mxu0 %v4859_v28 }
 0xadc   : > { %v7190_v37 = vpop.f32.mrf.mxu1 }
 0xade   : > { %v4417_v38 = vpop.f32.mrf.mxu1 }
 0xae0   : > { %v7204_v40 = vpop.f32.mrf.mxu1 }
 0xae2   : > { %v4581_v44 = vpop.f32.mrf.mxu1 }
 0xae4   : > { %v7183_v39 = vpop.f32.mrf.mxu0 }
 0xae5   : > { %v7218_v47 = vpop.f32.mrf.mxu1  ;;  %v4424_v25 = vadd.f32 %v7190_v37, %v7183_v39 }
 0xae6   : > { %v4326_v41 = vpop.f32.mrf.mxu0 }
 0xae7   : > { %v4418_v42 = vadd.f32 %v4417_v38, %v4326_v41  ;;  %v4745_v54 = vpop.f32.mrf.mxu1 }
 0xae9   : > { %v7197_v43 = vpop.f32.mrf.mxu0 }
 0xaea   : > { %v4507_v26 = vadd.f32 %v7197_v43, %v4424_v25  ;;  %v5837_v25 = vld [vmem:[%s8379_s8] sm:$0xff] }
 0xaeb   : > { %v4499_v45 = vpop.f32.mrf.mxu0 }
 0xaec   : > { %v4500_v46 = vadd.f32 %v4499_v45, %v4418_v42  ;;  %v4590_v27 = vadd.f32 %v7204_v40, %v4507_v26 }
 0xaed   : > { %v7232_v59 = vpop.f32.mrf.mxu1 }
 0xaee   : > { %v7211_v49 = vpop.f32.mrf.mxu0  ;;  %v4582_v50 = vadd.f32 %v4581_v44, %v4500_v46 }
 0xaef   : > { %v4946_v61 = vpop.f32.mrf.mxu1  ;;  %v4673_v28 = vadd.f32 %v7211_v49, %v4590_v27 }
 0xaf0   : > { %v4666_v51 = vpop.f32.mrf.mxu0 }
 0xaf1   : > { %v4667_v52 = vadd.f32 %v4666_v51, %v4582_v50 }
 0xaf3   : > { %v8189_v56 = vadd.f32 %v4745_v54, %v4667_v52 }
 0xaf5   : > { %v7246_v0 = vpop.f32.mrf.mxu1 }
 0xaf6   : > { %v7225_v57 = vpop.f32.mrf.mxu0 }
 0xaf7   : > { %v4953_v63 = vadd.f32 %v7232_v59, %v7225_v57  ;;  %v5110_v5 = vpop.f32.mrf.mxu1 }
 0xaf8   : > { %v4855_v60 = vpop.f32.mrf.mxu0 }
 0xaf9   : > { %v4947_v2 = vadd.f32 %v4946_v61, %v4855_v60 }
 0xafd   : > { %v7260_v7 = vpop.f32.mrf.mxu1 }
 0xafe   : > { %v7239_v62 = vpop.f32.mrf.mxu0 }
 0xaff   : > { %v5036_v3 = vadd.f32 %v7239_v62, %v4953_v63  ;;  %v5274_v15 = vpop.f32.mrf.mxu1 }
 0xb00   : > { %v5028_v1 = vpop.f32.mrf.mxu0 }
 0xb01   : > { %v5029_v4 = vadd.f32 %v5028_v1, %v4947_v2  ;;  %v5119_v6 = vadd.f32 %v7246_v0, %v5036_v3 }
 0xb03   : > { %v5111_v10 = vadd.f32 %v5110_v5, %v5029_v4 }
 0xb06   : > { %v7253_v8 = vpop.f32.mrf.mxu0 }
 0xb07   : > { %v5202_v9 = vadd.f32 %v7253_v8, %v5119_v6 }
 0xb08   : > { %v5195_v11 = vpop.f32.mrf.mxu0 }
 0xb09   : > { %v5281_v12 = vadd.f32 %v7260_v7, %v5202_v9  ;;  %v5196_v14 = vadd.f32 %v5195_v11, %v5111_v10  ;;  %v5840_v10 = vld [vmem:[%s8379_s8 + $0x18] sm:$0xff] }
 0xb0b   : > { %v5285_v16 = vmul.f32 0.35355338, %v5281_v12  ;;  %v5275_v17 = vadd.f32 %v5274_v15, %v5196_v14  ;;  %v8213_v12 = vand.u32 4294901760, %v5840_v10  ;;  %v5839_v14 = vld [vmem:[%s8379_s8 + $0x10] sm:$0xff] }
 0xb0d   : > { %v5284_v18 = vmul.f32 0.35355338, %v5275_v17  ;;  %v5287_v19 = vadd.f32 %v5285_v16, %v7878_v13  ;;  %v8219_v15 = vsub.f32 %v5840_v10, %v8213_v12  ;;  %v8221_v16 = vand.u32 4294901760, %v5839_v14  ;;  %v5838_v17 = vld [vmem:[%s8379_s8 + $0x8] sm:$0xff]  ;;  %v6525_v10 = vld [vmem:[%s8380_s9] ss:$0 sm:$0xff] }
 0xb0f   : > { %v5291_v20 = vsel %vm2089_vm2, %v5287_v19, -inf  ;;  %v5286_v22 = vadd.f32 %v5284_v18, %v7878_v13  ;;  %v4752_v13 = vadd.f32 %v7218_v47, %v4673_v28 }
 0xb10   : > { %5292 = vmax.xlane.f32.xlu1 %v5291_v20  ;;  %v8229_v20 = vand.u32 4294901760, %v8219_v15 }
 0xb11   : > { %v5288_v23 = vsel %vm2089_vm2, %v5286_v22, -inf }
 0xb12   : > { %5289 = vmax.xlane.f32.xlu0 %v5288_v23  ;;  %v8234_v23 = vand.u32 4294901760, %v5838_v17  ;;  %v5971_v27 = vsub.f32 %v8219_v15, %v8229_v20 }
 0xb21   : > { %5310 = vrot.lane.b32.xlu1 %v7864_v24, %s7535_s29 }
 0xb25   : > { %3688 = vrot.lane.b32.xlu1 %v8086_v58, %s8384_s17 }
 0xb29   : > { %3690 = vrot.lane.b32.xlu1 %v8084_v55, %s8384_s17 }
 0xb2d   : > { %4759 = vrot.lane.b32.xlu1 %v4752_v13, %s7537_s18  ;;  %v8247_v13 = vsub.f32 %v5838_v17, %v8234_v23 }
 0xb99   : > { %v5293_v29 = vpop.xlane.xlu1 %5292 }
 0xb9a   : > { %v5295_v30 = vsub.f32 %v5287_v19, %v5293_v29  ;;  %v8249_v29 = vand.u32 4294901760, %v5837_v25 }
 0xb9b   : > { %v5290_v31 = vpop.xlane.xlu0 %5289 }
 0xb9c   : > { %v5298_v32 = vmul.f32 1.442695, %v5295_v30  ;;  %v5294_v33 = vsub.f32 %v5286_v22, %v5290_v31  ;;  %v8232_v22 = vsub.f32 %v5839_v14, %v8221_v16 }
 0xb9d   : > { %v5311_v34 = vpop.permute.xlu1 %5310 }
 0xb9e   : > { %7451 = vpow2.f32 %v5298_v32  ;;  %v5296_v24 = vmul.f32 1.442695, %v5294_v33  ;;  %v5354_v41 = vand.u32 4294901760, %v5311_v34  ;;  %v8244_v28 = vand.u32 4294901760, %v8232_v22 }
 0xb9f   : > { %v5972_v33 = vand.u32 4294901760, %v5971_v27 }
 0xba0   : > { %7453 = vpow2.f32 %v5296_v24  ;;  %v5446_v43 = vsub.f32 %v5311_v34, %v5354_v41  ;;  %v5978_v34 = vsub.f32 %v8232_v22, %v8244_v28  ;;  %v8256_v24 = vand.u32 4294901760, %v8247_v13 }
 0xba1   : > { %v3689_v35 = vpop.permute.xlu1 %3688 }
 0xba2   : > { %3695 = vst.msk [vmem:[#allocation2] sm:$0xff] %vm3694_vm3, %v3689_v35  ;;  %v5447_v47 = vand.u32 4294901760, %v5446_v43  ;;  %v8259_v35 = vsub.f32 %v5837_v25, %v8249_v29 }
 0xba4   : > { %v5448_v52 = vsub.f32 %v5446_v43, %v5447_v47 }
 0xba5   : > { %v3691_v58 = vpop.permute.xlu1 %3690 }
 0xba6   : > { %3696 = vst.msk [vmem:[#allocation2 + $0x8] sm:$0xff] %vm3694_vm3, %v3691_v58  ;;  %v5449_v61 = vand.u32 4294901760, %v5448_v52 }
 0xba9   : > { %v4760_v36 = vpop.permute.xlu1 %4759 }
 0xbaa   : > { %4765 = vst.msk [vmem:[#allocation2 + $0x8] sm:$0xff] %vm4763_vm4, %v4760_v36 }
 0xbab   : > { %v7452_v55 = vpop.eup %7451 }
 0xbac   : > { %v5303_v37 = vsel %vm2089_vm2, %v7452_v55, 0.0 }
 0xbad   : > { %v7454_v38 = vpop.eup %7453  ;;  %5304 = vadd.xlane.f32.xlu0 %v5303_v37  ;;  %v5979_v37 = vand.u32 4294901760, %v5978_v34 }
 0xbae   : > { %v5300_v39 = vsel %vm2089_vm2, %v7454_v38, 0.0 }
 0xbb1   : > { %5301 = vadd.xlane.f32.xlu0 %v5300_v39  ;;  %v8266_v39 = vand.u32 4294901760, %v8259_v35 }
 0xbc7   : > { %5312 = vrot.lane.b32.xlu0 %v7862_v21, %s7535_s29  ;;  %s6519_s29 = sshll.u32 %s415_s28, 4 }
 0xbc8   : > { %s417_s26 = scalar_lea.vmem [#allocation3], %s6519_s29  ;;  %s7539_s29 = smov [#allocation3]  }
 0xbc9   : > { %s6444_s17 = sshll.u32 %s417_s26, 4  ;;  %s8327_s17 = int_to_ptr.vmem [resolvable:$true] %s6444_s17 }
 0xbca   : > { %s7463_s25 = scalar_lea.vmem %s8327_s17, 256 }
 0xbcb   : > { %4757 = vrot.lane.b32.xlu0 %v8189_v56, %s7537_s18  ;;  %s8330_s18 = scalar_lea.sflag [#allocation4], %s415_s28  ;;  %p7464_p11 = scmp.ne.s32.totalorder %s8327_s17, %s7463_s25 }
 0xbcd   : > { %p7465_p12 = pnand %p7464_p11, %p7644_p5 }
 0xbcf   : > { %p7466_p13 = pneg %p7465_p12 }
 0xc36   : > { %v5305_v40 = vpop.xlane.xlu0 %5304 }
 0xc37   : > { %7455 = vrcp.f32 %v5305_v40 }
 0xc3a   : > { %v5302_v42 = vpop.xlane.xlu0 %5301 }
 0xc3b   : > { %7457 = vrcp.f32 %v5302_v42 }
 0xc3e   : > { %v5313_v44 = vpop.permute.xlu0 %5312 }
 0xc3f   : > { %v5351_v45 = vand.u32 4294901760, %v5313_v44 }
 0xc41   : > { %v5439_v46 = vsub.f32 %v5313_v44, %v5351_v45  ;;  %7261 = vmatprep.subr.mxu0 %v5351_v45 }
 0xc42   : > { %7262 = vmatpush3.msra.mxu0 %v5351_v45  ;;  %v4758_v49 = vpop.permute.xlu0 %4757 }
 0xc43   : > { %4764 = vst.msk [vmem:[#allocation2] sm:$0xff] %vm4763_vm4, %v4758_v49  ;;  %7263 = vmatprep.subr.mxu0 %v5354_v41  ;;  %v5440_v50 = vand.u32 4294901760, %v5439_v46 }
 0xc44   : > { %v7456_v21 = vpop.eup %7455  ;;  %7264 = vmatpush3.msra.mxu0 %v5354_v41 }
 0xc45   : > { %7275 = vmatprep.subr.mxu0 %v5439_v46  ;;  %v5441_v51 = vsub.f32 %v5439_v46, %v5440_v50  ;;  %v5309_v54 = vmul.f32 %v7456_v21, %v7452_v55 }
 0xc47   : > { %v5442_v56 = vand.u32 4294901760, %v5441_v51  ;;  %v5320_v57 = vsel %vm2089_vm2, %v5309_v54, 0 }
 0xc48   : > { %v7458_v59 = vpop.eup %7457  ;;  %v5399_v60 = vand.u32 4294901760, %v5320_v57 }
 0xc49   : > { %7268 = vmatprep.subr.mxu1 %v5442_v56  ;;  %v5307_v62 = vmul.f32 %v7458_v59, %v7454_v38  ;;  %v5985_v38 = vsub.f32 %v8247_v13, %v8256_v24 }
 0xc4a   : > { %7269 = vmatpush3.msra.mxu1 %v5442_v56  ;;  %v5400_v63 = vsub.f32 %v5320_v57, %v5399_v60 }
 0xc4b   : > { %7270 = vmatprep.subr.mxu1 %v5449_v61  ;;  %v5317_v0 = vsel %vm2089_vm2, %v5307_v62, 0  ;;  %v5986_v44 = vand.u32 4294901760, %v5985_v38 }
 0xc4c   : > { %7271 = vmatpush3.msra.mxu1 %v5449_v61  ;;  %v5389_v1 = vand.u32 4294901760, %v5317_v0  ;;  %v5401_v2 = vand.u32 4294901760, %v5400_v63 }
 0xc4d   : > { %7282 = vmatprep.subr.mxu1 %v5351_v45 }
 0xc4e   : > { %7272 = vmatprep.mubr.f32.mxu1 %v5389_v1  ;;  %v5390_v3 = vsub.f32 %v5317_v0, %v5389_v1  ;;  %v5402_v5 = vsub.f32 %v5400_v63, %v5401_v2 }
 0xc4f   : > { %7273 = vmatmul.mubr.f32.vlgmr.msra.gmra.mxu1 %v5399_v60 }
 0xc50   : > { %7283 = vmatpush3.msra.mxu1 %v5351_v45  ;;  %v5391_v4 = vand.u32 4294901760, %v5390_v3  ;;  %v5403_v8 = vand.u32 4294901760, %v5402_v5 }
 0xc51   : > { %7284 = vmatprep.subr.mxu1 %v5354_v41 }
 0xc52   : > { %7285 = vmatpush3.msra.mxu1 %v5354_v41  ;;  %7286 = vmatprep.mubr.f32.mxu1 %v5391_v4  ;;  %v5392_v6 = vsub.f32 %v5390_v3, %v5391_v4 }
 0xc53   : > { %7296 = vmatprep.subr.mxu1 %v5351_v45  ;;  %7287 = vmatmul.mubr.f32.vlgmr.msra.gmra.mxu1 %v5401_v2 }
 0xc54   : > { %7297 = vmatpush3.msra.mxu1 %v5351_v45  ;;  %7300 = vmatprep.mubr.f32.mxu1 %v5389_v1  ;;  %v5393_v7 = vand.u32 4294901760, %v5392_v6  ;;  %v5992_v45 = vsub.f32 %v8259_v35, %v8266_v39 }
 0xc55   : > { %7298 = vmatprep.subr.mxu1 %v5354_v41 }
 0xc56   : > { %7299 = vmatpush3.msra.mxu1 %v5354_v41  ;;  %7265 = vmatprep.mubr.f32.mxu0 %v5393_v7 }
 0xc57   : > { %7266 = vmatmul.mubr.f32.vlgmr.msra.gmra.mxu0 %v5403_v8  ;;  %7301 = vmatmul.mubr.f32.vlgmr.msra.gmra.mxu1 %v5399_v60 }
 0xc58   : > { %7276 = vmatpush3.msra.mxu0 %v5439_v46  ;;  %7279 = vmatprep.mubr.f32.mxu0 %v5390_v3 }
 0xc59   : > { %7277 = vmatprep.subr.mxu0 %v5446_v43  ;;  %7314 = vmatprep.subr.mxu1 %v5972_v33 }
 0xc5a   : > { %7278 = vmatpush3.msra.mxu0 %v5446_v43  ;;  %7315 = vmatpush3.msra.mxu1 %v5972_v33 }
 0xc5b   : > { %7289 = vmatprep.subr.mxu0 %v5440_v50  ;;  %7280 = vmatmul.mubr.f32.vlgmr.msra.gmra.mxu0 %v5400_v63 }
 0xc5c   : > { %7290 = vmatpush3.msra.mxu0 %v5440_v50  ;;  %7293 = vmatprep.mubr.f32.mxu0 %v5389_v1  ;;  %v5993_v50 = vand.u32 4294901760, %v5992_v45 }
 0xc5d   : > { %7291 = vmatprep.subr.mxu0 %v5447_v47  ;;  %7316 = vmatprep.subr.mxu1 %v5979_v37 }
 0xc5e   : > { %7292 = vmatpush3.msra.mxu0 %v5447_v47  ;;  %7317 = vmatpush3.msra.mxu1 %v5979_v37 }
 0xc5f   : > { %7294 = vmatmul.mubr.f32.vlgmr.msra.gmra.mxu0 %v5399_v60  ;;  %7303 = vmatprep.subr.mxu0 %v8213_v12 }
 0xc60   : > { %7304 = vmatpush3.msra.mxu0 %v8213_v12  ;;  %7318 = vmatprep.subr.mxu1 %v5986_v44 }
 0xc61   : > { %7305 = vmatprep.subr.mxu0 %v8221_v16  ;;  %7319 = vmatpush3.msra.mxu1 %v5986_v44 }
 0xc62   : > { %7306 = vmatpush3.msra.mxu0 %v8221_v16  ;;  %7320 = vmatprep.subr.mxu1 %v5993_v50 }
 0xc63   : > { %7307 = vmatprep.subr.mxu0 %v8234_v23  ;;  %7321 = vmatpush3.msra.mxu1 %v5993_v50 }
 0xc64   : > { %7308 = vmatpush3.msra.mxu0 %v8234_v23  ;;  %7336 = vmatprep.subr.mxu1 %v8213_v12 }
 0xc65   : > { %7309 = vmatprep.subr.mxu0 %v8249_v29 }
 0xc66   : > { %7310 = vmatpush3.msra.mxu0 %v8249_v29 }
 0xc67   : > { %7325 = vmatprep.subr.mxu0 %v8219_v15 }
 0xd0f   : > { %v7274_v9 = vpop.f32.mrf.mxu1 }
 0xd11   : > { %v5486_v11 = vpop.f32.mrf.mxu1 }
 0xd13   : > { %v7288_v18 = vpop.f32.mrf.mxu1 }
 0xd15   : > { %v5650_v31 = vpop.f32.mrf.mxu1 }
 0xd17   : > { %v7267_v19 = vpop.f32.mrf.mxu0  ;;  %v7302_v42 = vpop.f32.mrf.mxu1 }
 0xd18   : > { %v5493_v30 = vadd.f32 %v7274_v9, %v7267_v19 }
 0xd19   : > { %v5395_v26 = vpop.f32.mrf.mxu0  ;;  %v5814_v52 = vpop.f32.mrf.mxu1 }
 0xd1a   : > { %v5487_v58 = vadd.f32 %v5486_v11, %v5395_v26 }
 0xd1b   : > { %v7281_v32 = vpop.f32.mrf.mxu0 }
 0xd1c   : > { %v5576_v36 = vadd.f32 %v7281_v32, %v5493_v30 }
 0xd1d   : > { %v5568_v55 = vpop.f32.mrf.mxu0 }
 0xd1e   : > { %v5569_v40 = vadd.f32 %v5568_v55, %v5487_v58  ;;  %v5659_v41 = vadd.f32 %v7288_v18, %v5576_v36 }
 0xd1f   : > { %v7295_v43 = vpop.f32.mrf.mxu0 }
 0xd20   : > { %v5742_v46 = vadd.f32 %v7295_v43, %v5659_v41  ;;  %v5651_v47 = vadd.f32 %v5650_v31, %v5569_v40 }
 0xd21   : > { %v5735_v49 = vpop.f32.mrf.mxu0 }
 0xd22   : > { %v5821_v21 = vadd.f32 %v7302_v42, %v5742_v46  ;;  %v5736_v51 = vadd.f32 %v5735_v49, %v5651_v47 }
 0xd24   : > { %v5815_v54 = vadd.f32 %v5814_v52, %v5736_v51  ;;  %5828 = vrot.lane.b32.xlu1 %v5821_v21, %s7538_s19  ;;  %v6526_v52 = vld [vmem:[%s8381_s10] ss:$0 sm:$0xff] }
 0xd26   : > { %5826 = vrot.lane.b32.xlu0 %v5815_v54, %s7538_s19  ;;  %s7467_s19 = sshll.u32 %s7539_s29, 4  ;;  %s7468_s19 = int_to_ptr.vmem [resolvable:$false] %s7467_s19 }
 0xd27   : > { %s7469_s0 = scalar_lea.vmem %s7468_s19, 512  ;;  %p7470_p0 = scmp.lt.s32.totalorder %s8327_s17, %s7468_s19 }
 0xd28   : > { %p7471_p1 = scmp.lt.s32.totalorder %s7469_s0, %s7463_s25 }
 0xd2a   : > { %p7472_p2 = por %p7471_p1, %p7470_p0 }
 0xd2c   : > { %p7473_p3 = pnand %p7472_p2, %p7466_p13 }
 0xd96   : > { %v5829_v56 = vpop.permute.xlu1 %5828 }
 0xd97   : > { %5834 = vst.msk [vmem:[#allocation2 + $0x8] sm:$0xff] %vm5832_vm5, %v5829_v56  ;;  %v6527_v56 = vld [vmem:[%s8382_s11] ss:$0 sm:$0xff] }
 0xd98   : > { %v5827_v57 = vpop.permute.xlu0 %5826 }
 0xd99   : > { %5833 = vst.msk [vmem:[#allocation2] sm:$0xff] %vm5832_vm5, %v5827_v57 }
 0xd9e   : > { %v5836_v59 = vld [vmem:[#allocation2 + $0x8] sm:$0xff] }
 0xd9f   : > { %v5852_v60 = vsel %vm434_vm0, %v5836_v59, 0 }
 0xda0   : > { %v5835_v61 = vld [vmem:[#allocation2] sm:$0xff]  ;;  %v5933_v62 = vand.u32 4294901760, %v5852_v60 }
 0xda1   : > { %v5849_v63 = vsel %vm434_vm0, %v5835_v61, 0 }
 0xda2   : > { %v5923_v0 = vand.u32 4294901760, %v5849_v63  ;;  %v5934_v1 = vsub.f32 %v5852_v60, %v5933_v62 }
 0xda4   : > { %7322 = vmatprep.mubr.f32.mxu1 %v5923_v0  ;;  %v5924_v2 = vsub.f32 %v5849_v63, %v5923_v0  ;;  %v5935_v3 = vand.u32 4294901760, %v5934_v1 }
 0xda5   : > { %7323 = vmatmul.mubr.f32.vlgmr.msra.gmra.mxu1 %v5933_v62 }
 0xda6   : > { %7337 = vmatpush3.msra.mxu1 %v8213_v12  ;;  %v5925_v4 = vand.u32 4294901760, %v5924_v2  ;;  %v5936_v6 = vsub.f32 %v5934_v1, %v5935_v3 }
 0xda7   : > { %7338 = vmatprep.subr.mxu1 %v8221_v16 }
 0xda8   : > { %7339 = vmatpush3.msra.mxu1 %v8221_v16  ;;  %7344 = vmatprep.mubr.f32.mxu1 %v5925_v4  ;;  %v5926_v5 = vsub.f32 %v5924_v2, %v5925_v4  ;;  %v5937_v8 = vand.u32 4294901760, %v5936_v6 }
 0xda9   : > { %7340 = vmatprep.subr.mxu1 %v8234_v23 }
 0xdaa   : > { %7341 = vmatpush3.msra.mxu1 %v8234_v23  ;;  %v5927_v7 = vand.u32 4294901760, %v5926_v5 }
 0xdab   : > { %7342 = vmatprep.subr.mxu1 %v8249_v29 }
 0xdac   : > { %7343 = vmatpush3.msra.mxu1 %v8249_v29  ;;  %7311 = vmatprep.mubr.f32.mxu0 %v5927_v7 }
 0xdad   : > { %7345 = vmatmul.mubr.f32.vlgmr.msra.gmra.mxu1 %v5935_v3  ;;  %7358 = vmatprep.subr.mxu1 %v8213_v12 }
 0xdae   : > { %7312 = vmatmul.mubr.f32.vlgmr.msra.gmra.mxu0 %v5937_v8  ;;  %7359 = vmatpush3.msra.mxu1 %v8213_v12 }
 0xdaf   : > { %7326 = vmatpush3.msra.mxu0 %v8219_v15  ;;  %7366 = vmatprep.mubr.f32.mxu1 %v5923_v0 }
 0xdb0   : > { %7327 = vmatprep.subr.mxu0 %v8232_v22  ;;  %7333 = vmatprep.mubr.f32.mxu0 %v5924_v2 }
 0xdb1   : > { %7360 = vmatprep.subr.mxu1 %v8221_v16  ;;  %7328 = vmatpush3.msra.mxu0 %v8232_v22 }
 0xdb2   : > { %7361 = vmatpush3.msra.mxu1 %v8221_v16  ;;  %7329 = vmatprep.subr.mxu0 %v8247_v13 }
 0xdb3   : > { %7362 = vmatprep.subr.mxu1 %v8234_v23  ;;  %7330 = vmatpush3.msra.mxu0 %v8247_v13 }
 0xdb4   : > { %7363 = vmatpush3.msra.mxu1 %v8234_v23  ;;  %7331 = vmatprep.subr.mxu0 %v8259_v35 }
 0xdb5   : > { %7364 = vmatprep.subr.mxu1 %v8249_v29  ;;  %7332 = vmatpush3.msra.mxu0 %v8259_v35 }
 0xdb6   : > { %7365 = vmatpush3.msra.mxu1 %v8249_v29  ;;  %7334 = vmatmul.mubr.f32.vlgmr.msra.gmra.mxu0 %v5934_v1 }
 0xdb7   : > { %7347 = vmatprep.subr.mxu0 %v8229_v20  ;;  %7367 = vmatmul.mubr.f32.vlgmr.msra.gmra.mxu1 %v5933_v62 }
 0xdb8   : > { %7348 = vmatpush3.msra.mxu0 %v8229_v20  ;;  %7355 = vmatprep.mubr.f32.mxu0 %v5923_v0 }
 0xdb9   : > { %7349 = vmatprep.subr.mxu0 %v8244_v28 }
 0xdba   : > { %7350 = vmatpush3.msra.mxu0 %v8244_v28 }
 0xdbb   : > { %7351 = vmatprep.subr.mxu0 %v8256_v24 }
 0xdbc   : > { %7352 = vmatpush3.msra.mxu0 %v8256_v24 }
 0xdbd   : > { %7353 = vmatprep.subr.mxu0 %v8266_v39 }
 0xdbe   : > { %7354 = vmatpush3.msra.mxu0 %v8266_v39 }
 0xdbf   : > { %7356 = vmatmul.mubr.f32.vlgmr.msra.gmra.mxu0 %v5933_v62 }
 0xe65   : > { %v7324_v11 = vpop.f32.mrf.mxu1 }
 0xe67   : > { %v6030_v17 = vpop.f32.mrf.mxu1 }
 0xe6d   : > { %v7346_v19 = vpop.f32.mrf.mxu1 }
 0xe6e   : > { %v7313_v9 = vpop.f32.mrf.mxu0 }
 0xe6f   : > { %v5940_v14 = vadd.f32 %v7313_v9, %v6525_v10  ;;  %v6200_v26 = vpop.f32.mrf.mxu1 }
 0xe70   : > { %v5929_v12 = vpop.f32.mrf.mxu0 }
 0xe71   : > { %v5930_v15 = vadd.f32 %v6525_v10, %v5929_v12  ;;  %v6037_v18 = vadd.f32 %v7324_v11, %v5940_v14 }
 0xe73   : > { %v6031_v23 = vadd.f32 %v6030_v17, %v5930_v15 }
 0xe76   : > { %v7335_v16 = vpop.f32.mrf.mxu0 }
 0xe77   : > { %v6124_v22 = vadd.f32 %v7335_v16, %v6037_v18  ;;  %v7368_v28 = vpop.f32.mrf.mxu1 }
 0xe78   : > { %v6116_v20 = vpop.f32.mrf.mxu0 }
 0xe79   : > { %v6117_v25 = vadd.f32 %v6116_v20, %v6031_v23  ;;  %v6209_v27 = vadd.f32 %v7346_v19, %v6124_v22  ;;  %v6372_v34 = vpop.f32.mrf.mxu1 }
 0xe7b   : > { %v6201_v30 = vadd.f32 %v6200_v26, %v6117_v25 }
 0xe7f   : > { %v7357_v13 = vpop.f32.mrf.mxu0 }
 0xe80   : > { %v6298_v29 = vadd.f32 %v7357_v13, %v6209_v27 }
 0xe81   : > { %v6291_v31 = vpop.f32.mrf.mxu0 }
 0xe82   : > { %v6379_v32 = vadd.f32 %v7368_v28, %v6298_v29  ;;  %v6292_v33 = vadd.f32 %v6291_v31, %v6201_v30 }
 0xe84   : > { %v6373_v24 = vadd.f32 %v6372_v34, %v6292_v33  ;;  %v6383_v35 = vadd.f32 %v6379_v32, %v7825_v53 }
 0xe86   : > { %v6389_v58 = vsel %vm434_vm0, %v6383_v35, 0.0  ;;  %v6382_v36 = vadd.f32 %v6373_v24, %v7820_v48 }
 0xe87   : > { %6390 = vadd.xlane.f32.xlu1 %v6389_v58 }
 0xe88   : > { %v6386_v55 = vsel %vm434_vm0, %v6382_v36, 0.0 }
 0xe89   : > { %6387 = vadd.xlane.f32.xlu0 %v6386_v55 }
 0xf10   : > { %v6391_v37 = vpop.xlane.xlu1 %6390 }
 0xf11   : > { %v6393_v38 = vmul.f32 0.03125, %v6391_v37 }
 0xf12   : > { %v6388_v39 = vpop.xlane.xlu0 %6387 }
 0xf13   : > { %v6392_v40 = vmul.f32 0.03125, %v6388_v39  ;;  %v6395_v41 = vsub.f32 %v6383_v35, %v6393_v38 }
 0xf15   : > { %v6394_v42 = vsub.f32 %v6382_v36, %v6392_v40  ;;  %v6397_v45 = vmul.f32 %v6395_v41, %v6395_v41 }
 0xf17   : > { %v6396_v43 = vmul.f32 %v6394_v42, %v6394_v42  ;;  %v6401_v53 = vsel %vm434_vm0, %v6397_v45, 0.0 }
 0xf19   : > { %v6398_v44 = vsel %vm434_vm0, %v6396_v43, 0.0 }
 0xf1a   : > { %6399 = vadd.xlane.f32.xlu0 %v6398_v44 }
 0xf1e   : > { %6402 = vadd.xlane.f32.xlu0 %v6401_v53 }
 0xfa3   : > { %v6400_v48 = vpop.xlane.xlu0 %6399 }
 0xfa4   : > { %v6404_v46 = vmul.f32 0.03125, %v6400_v48 }
 0xfa6   : > { %v6406_v47 = vadd.f32 1e-05, %v6404_v46 }
 0xfa7   : > { %v6403_v49 = vpop.xlane.xlu0 %6402 }
 0xfa8   : > { %7459 = vrsqrt.f32 %v6406_v47  ;;  %v6405_v50 = vmul.f32 0.03125, %v6403_v49 }
 0xfaa   : > { %v6407_v21 = vadd.f32 1e-05, %v6405_v50 }
 0xfac   : > { %7461 = vrsqrt.f32 %v6407_v21 }
 0xfb5   : > { %v7460_v51 = vpop.eup %7459 }
 0xfb6   : > { %v6410_v54 = vmul.f32 %v7460_v51, %v6394_v42 }
 0xfb8   : > { %v6418_v57 = vmul.f32 %v6526_v52, %v6410_v54 }
 0xfb9   : > { %v7462_v59 = vpop.eup %7461 }
 0xfba   : > { %v6411_v60 = vmul.f32 %v7462_v59, %v6395_v41  ;;  %v6426_v61 = vadd.f32 %v6527_v56, %v6418_v57 }
 0xfbc   : > { %v6419_v62 = vmul.f32 %v6526_v52, %v6411_v60  ;;  %6428 = vst.msk [vmem:[%s417_s26] sm:$0xff] %vm434_vm0, %v6426_v61 }
 0xfbe   : > { %v6427_v63 = vadd.f32 %v6527_v56, %v6419_v62 }
 0xfc0   : > { %6429 = vst.msk [vmem:[%s417_s26 + $0x8] sm:$0xff] %vm434_vm0, %v6427_v63 }
 0xfc1   : > { %7476 = shalt.err (!%p7473_p3)
}
 0xfc2   : > { %s7477_s28 = scalar_lea.hbm %s8325_s16, 256  ;;  %s7481_s15 = scalar_lea.hbm %s8383_s12, 512 }
 0xfc3   : > { %p7478_p4 = scmp.ne.s32.totalorder %s8325_s16, %s7477_s28  ;;  %p7482_p9 = scmp.lt.s32.totalorder %s8325_s16, %s8383_s12 }
 0xfc4   : > { %p7483_p10 = scmp.lt.s32.totalorder %s7481_s15, %s7477_s28 }
 0xfc5   : > { %p7479_p7 = pnand %p7478_p4, %p7644_p5 }
 0xfc6   : > { %p7484_p11 = por %p7483_p10, %p7482_p9 }
 0xfc7   : > { %p7480_p8 = pneg %p7479_p7 }
 0xfc9   : > { %p7485_p12 = pnand %p7484_p11, %p7480_p8 }
 0xfcb   : > { %7488 = shalt.err (!%p7485_p12)
}
 0xfcc   : > { %s7540_s25 = smov 128   ;;  %s8391_s19 = smov 8  }
 0xfcd   : > { %7369 = dma.vmem_to_hbm [thread:$0]  (%p7644_p5), %s8327_s17, 256, %s8325_s16, %s8330_s18, %s7540_s25, %s7540_s25, %s8391_s19  }
 0xfce PF: > { %p7375_p13 = scmp.ge.s32.totalorder %s7523_s24, 2  ;;  %s6459_s0 = sand.u32 1, %s7511_s21  }
 0xfcf   : > { %s6460_s1 = scalar_lea.sflag [#allocation4], %s6459_s0 }
 0xfd0   : > { %p7372_p0 = pnand %p7375_p13, %p7648_p6 }
 0xfd2   : > { %p7373_p1 = pneg %p7372_p0 }
 0xfd4   : > { %7506 = dma.done.wait (%p7373_p1), %s6460_s1, 256  }
 0xfd5   : > { %7508 = vsyncadd (%p7373_p1), %s6460_s1, 4294967040  ;;  %p22_p2 = scmp.ge.s32.totalorder %s7631_s27, 4   ;;  %s8392_s21 = smov %s7515_s22 }
 0xfd6   : > { %s8393_s22 = smov %s7519_s23  ;;  %s8394_s23 = smov %s7642_s30 }
 0xfd7   : > { %s8395_s24 = smov %s7631_s27  ;;  %24 = sbr.rel (!%p22_p2) target bundleno = 6 (0x6), region = 106 }
 0xfdc   :  { %6465 = vsyncpa [#allocation4], 1 }
 0xfdd   :  { %6467 = vsyncpa [#allocation4 + $0x1], 1 }

</bundles_post_ra>
